<compile_context>
chip_gen: v7x
topology: tpu7x:2x2x1
jax: 0.10.0
libtpu: 0.0.40
codegen_flags: <defaults>
</compile_context>

<pallas_src>
import functools

import jax
import jax.numpy as jnp
from jax import lax
from jax.experimental import pallas as pl
from jax.experimental.pallas import tpu as pltpu


# Tile targets (multiples of 256 for v6e/v7x MXU; shrunk automatically for
# small dims).  VMEM limit leaves headroom on v7x's 64 MiB per-TC VMEM.
TM, TN, TK = 256, 256, 512
VMEM_LIMIT = 48 * 1024 * 1024


def _tile(dim, target):
    """Largest tile <= target that divides dim (full dim if it is small)."""
    if dim <= target:
        return dim
    t = target
    while t >= 128:
        if dim % t == 0:
            return t
        t //= 2
    return dim  # non-aligned dim: fall back to a single block


def _cparams(*sems):
    return pltpu.CompilerParams(
        dimension_semantics=sems, vmem_limit_bytes=VMEM_LIMIT
    )


# ----------------------------- Pallas kernels ------------------------------

def _ln_matmul_kernel(x_ref, g_ref, be_ref, w_ref, b_ref, o_ref, *, activation):
    """LayerNorm(x) @ W + b, optional tanh-GELU.  LN stats in f32, MXU in bf16."""
    x = x_ref[...]
    mu = jnp.mean(x, axis=-1, keepdims=True)
    xc = x - mu
    var = jnp.mean(xc * xc, axis=-1, keepdims=True)
    h = (xc * lax.rsqrt(var + 1e-5) * g_ref[...] + be_ref[...]).astype(jnp.bfloat16)
    y = jnp.dot(h, w_ref[...], preferred_element_type=jnp.float32) + b_ref[...]
    if activation == "gelu":
        # tanh-approx GELU (nanoGPT "new GELU")
        y = 0.5 * y * (1.0 + jnp.tanh(0.7978845608028654 * (y + 0.044715 * y * y * y)))
    o_ref[...] = y


def _matmul_res_kernel(x_ref, w_ref, b_ref, r_ref, o_ref, acc_ref):
    """res + x @ W + b with K-tiled accumulation in f32 VMEM scratch."""
    @pl.when(pl.program_id(2) == 0)
    def _():
        acc_ref[...] = jnp.zeros_like(acc_ref)

    acc_ref[...] += jnp.dot(
        x_ref[...].astype(jnp.bfloat16), w_ref[...],
        preferred_element_type=jnp.float32,
    )

    @pl.when(pl.program_id(2) == pl.num_programs(2) - 1)
    def _():
        o_ref[...] = acc_ref[...] + b_ref[...] + r_ref[...]


def _lnf_lmhead_kernel(x_ref, g_ref, be_ref, wte_ref, o_ref):
    """Final LayerNorm fused with weight-tied lm_head; contracts against the
    UNtransposed (vocab_tile, C) embedding rows — no wte.T copy in HBM."""
    x = x_ref[...]
    mu = jnp.mean(x, axis=-1, keepdims=True)
    xc = x - mu
    var = jnp.mean(xc * xc, axis=-1, keepdims=True)
    h = (xc * lax.rsqrt(var + 1e-5) * g_ref[...] + be_ref[...]).astype(jnp.bfloat16)
    w = wte_ref[...].astype(jnp.bfloat16)                     # (tv, C)
    o_ref[...] = lax.dot_general(
        h, w, (((1,), (1,)), ((), ())), preferred_element_type=jnp.float32
    )


def _add_row_kernel(x_ref, v_ref, o_ref):
    # steering-vector (activation addition) broadcast over rows
    o_ref[...] = x_ref[...] + v_ref[...]


def _attn_kernel(qkv_ref, o_ref, *, n_head, scale):
    """Causal multi-head attention for one batch element.

    qkv_ref block: (1, T, 3C).  All heads are handled inside the kernel and the
    output is written as one lane-dense (T, C) store.
    """
    t = qkv_ref.shape[1]
    c = qkv_ref.shape[2] // 3
    hd = c // n_head

    qkv = qkv_ref[0].astype(jnp.bfloat16)                     # (T, 3C)
    rows = lax.broadcasted_iota(jnp.int32, (t, t), 0)
    cols = lax.broadcasted_iota(jnp.int32, (t, t), 1)
    mask = cols <= rows

    outs = []
    for h in range(n_head):
        lo = h * hd
        q = qkv[:, lo:lo + hd]
        k = qkv[:, c + lo:c + lo + hd]
        v = qkv[:, 2 * c + lo:2 * c + lo + hd]
        # scores without materializing k.T (contract on head dim)
        s = lax.dot_general(
            q, k, (((1,), (1,)), ((), ())), preferred_element_type=jnp.float32
        ) * scale
        s = jnp.where(mask, s, -1e30)
        m = jnp.max(s, axis=-1, keepdims=True)
        p = jnp.exp(s - m)
        denom = jnp.sum(p, axis=-1, keepdims=True)
        p = p * pl.reciprocal(denom, approx=True)
        outs.append(
            jnp.dot(p.astype(jnp.bfloat16), v, preferred_element_type=jnp.float32)
        )
    o_ref[0] = jnp.concatenate(outs, axis=-1)


# ------------------------------ thin wrappers -------------------------------

def pallas_ln_matmul(x, g, be, w, b, *, activation=None):
    m, c = x.shape
    n = w.shape[1]
    tm, tn = _tile(m, TM), _tile(n, TN)
    kern = functools.partial(_ln_matmul_kernel, activation=activation)
    return pl.pallas_call(
        kern,
        out_shape=jax.ShapeDtypeStruct((m, n), jnp.float32),
        grid=(m // tm, n // tn),
        in_specs=[
            pl.BlockSpec((tm, c), lambda i, j: (i, 0)),
            pl.BlockSpec((1, c), lambda i, j: (0, 0)),
            pl.BlockSpec((1, c), lambda i, j: (0, 0)),
            pl.BlockSpec((c, tn), lambda i, j: (0, j)),
            pl.BlockSpec((1, tn), lambda i, j: (0, j)),
        ],
        out_specs=pl.BlockSpec((tm, tn), lambda i, j: (i, j)),
        compiler_params=_cparams("parallel", "parallel"),
    )(x, g.reshape(1, c), be.reshape(1, c), w, b.reshape(1, n))


def pallas_matmul_residual(x, w, b, res):
    m, k = x.shape
    n = w.shape[1]
    tm, tn, tk = _tile(m, TM), _tile(n, TN), _tile(k, TK)
    return pl.pallas_call(
        _matmul_res_kernel,
        out_shape=jax.ShapeDtypeStruct((m, n), jnp.float32),
        grid=(m // tm, n // tn, k // tk),
        in_specs=[
            pl.BlockSpec((tm, tk), lambda i, j, kk: (i, kk)),
            pl.BlockSpec((tk, tn), lambda i, j, kk: (kk, j)),
            pl.BlockSpec((1, tn), lambda i, j, kk: (0, j)),
            pl.BlockSpec((tm, tn), lambda i, j, kk: (i, j)),
        ],
        out_specs=pl.BlockSpec((tm, tn), lambda i, j, kk: (i, j)),
        scratch_shapes=[pltpu.VMEM((tm, tn), jnp.float32)],
        compiler_params=_cparams("parallel", "parallel", "arbitrary"),
    )(x, w, b.reshape(1, n), res)


def pallas_lnf_lmhead(x, g, be, wte):
    m, c = x.shape
    v = wte.shape[0]
    tm, tv = _tile(m, TM), _tile(v, TN)
    return pl.pallas_call(
        _lnf_lmhead_kernel,
        out_shape=jax.ShapeDtypeStruct((m, v), jnp.float32),
        grid=(m // tm, v // tv),
        in_specs=[
            pl.BlockSpec((tm, c), lambda i, j: (i, 0)),
            pl.BlockSpec((1, c), lambda i, j: (0, 0)),
            pl.BlockSpec((1, c), lambda i, j: (0, 0)),
            pl.BlockSpec((tv, c), lambda i, j: (j, 0)),
        ],
        out_specs=pl.BlockSpec((tm, tv), lambda i, j: (i, j)),
        compiler_params=_cparams("parallel", "parallel"),
    )(x, g.reshape(1, c), be.reshape(1, c), wte)


def pallas_add_row(x, v):
    m, c = x.shape
    tm = _tile(m, TM)
    return pl.pallas_call(
        _add_row_kernel,
        out_shape=jax.ShapeDtypeStruct((m, c), jnp.float32),
        grid=(m // tm,),
        in_specs=[
            pl.BlockSpec((tm, c), lambda i: (i, 0)),
            pl.BlockSpec((1, c), lambda i: (0, 0)),
        ],
        out_specs=pl.BlockSpec((tm, c), lambda i: (i, 0)),
        compiler_params=_cparams("parallel"),
    )(x, v.reshape(1, c))


def pallas_causal_attention(qkv, n_head):
    b, t, c3 = qkv.shape
    c = c3 // 3
    hd = c // n_head
    scale = 1.0 / (hd ** 0.5)
    kern = functools.partial(_attn_kernel, n_head=n_head, scale=scale)
    return pl.pallas_call(
        kern,
        out_shape=jax.ShapeDtypeStruct((b, t, c), jnp.float32),
        grid=(b,),
        in_specs=[pl.BlockSpec((1, t, c3), lambda i: (i, 0, 0))],
        out_specs=pl.BlockSpec((1, t, c), lambda i: (i, 0, 0)),
        compiler_params=_cparams("parallel"),
    )(qkv)


# ------------------------------- GPT forward --------------------------------

def gpt_with_activation_addition_forward(params, idx, *, n_head, steer_layer):
    B, T = idx.shape
    C = params["wte"].shape[1]
    vocab = params["wte"].shape[0]

    tok = jnp.take(params["wte"], idx, axis=0)            # (B, T, C) gather
    pos = params["wpe"][:T][None]                          # (1, T, C)
    x = (tok + pos).astype(jnp.float32).reshape(B * T, C)

    for i, blk in enumerate(params["blocks"]):
        # activation addition: steering matrix is zero except row steer_layer,
        # so the add is only emitted for that block.
        if i == steer_layer:
            x = pallas_add_row(x, params["steer_w"][0])

        # --- causal self-attention (LN1 + QKV fused; proj + residual fused) ---
        qkv = pallas_ln_matmul(x, blk["ln1_g"], blk["ln1_b"],
                               blk["attn_w"], blk["attn_b"])       # (B*T, 3C)
        att = pallas_causal_attention(qkv.reshape(B, T, 3 * C), n_head)
        x = pallas_matmul_residual(att.reshape(B * T, C),
                                   blk["proj_w"], blk["proj_b"], x)

        # --- MLP (LN2 + fc + GELU fused; proj + residual fused) ---
        h = pallas_ln_matmul(x, blk["ln2_g"], blk["ln2_b"],
                             blk["fc_w"], blk["fc_b"], activation="gelu")
        x = pallas_matmul_residual(h, blk["mlpproj_w"], blk["mlpproj_b"], x)

    # final LN + weight-tied lm_head (vocab-tiled, no wte.T materialization)
    logits = pallas_lnf_lmhead(x, params["lnf_g"], params["lnf_b"], params["wte"])
    return logits.reshape(B, T, vocab)


# --------------------------- deterministic params ----------------------------

def init_params(key, *, vocab, block_size, n_layer, n_embd):
    ks = iter(jax.random.split(key, 8 + 8 * n_layer))

    def nrm(k, shp, dtype=jnp.float32):
        return (0.02 * jax.random.normal(k, shp)).astype(dtype)

    params = {
        "wte": nrm(next(ks), (vocab, n_embd)),                   # f32 (tied head)
        "wpe": nrm(next(ks), (block_size, n_embd)),
        "lnf_g": jnp.ones((n_embd,), jnp.float32),
        "lnf_b": jnp.zeros((n_embd,), jnp.float32),
        # activation_layers = nn.Sequential(nn.Linear(n_embd, 1)) -> weight (1, n_embd)
        "steer_w": nrm(next(ks), (1, n_embd)),
        "blocks": [],
    }
    for _ in range(n_layer):
        params["blocks"].append(
            {
                "ln1_g": jnp.ones((n_embd,), jnp.float32),
                "ln1_b": jnp.zeros((n_embd,), jnp.float32),
                "attn_w": nrm(next(ks), (n_embd, 3 * n_embd), jnp.bfloat16),
                "attn_b": jnp.zeros((3 * n_embd,), jnp.float32),
                "proj_w": nrm(next(ks), (n_embd, n_embd), jnp.bfloat16),
                "proj_b": jnp.zeros((n_embd,), jnp.float32),
                "ln2_g": jnp.ones((n_embd,), jnp.float32),
                "ln2_b": jnp.zeros((n_embd,), jnp.float32),
                "fc_w": nrm(next(ks), (n_embd, 4 * n_embd), jnp.bfloat16),
                "fc_b": jnp.zeros((4 * n_embd,), jnp.float32),
                "mlpproj_w": nrm(next(ks), (4 * n_embd, n_embd), jnp.bfloat16),
                "mlpproj_b": jnp.zeros((n_embd,), jnp.float32),
            }
        )
    return params


# ----------------------------------- main ------------------------------------

if __name__ == "__main__":
    VOCAB, BLOCK_SIZE, N_LAYER, N_HEAD, N_EMBD = 64, 16, 2, 2, 32
    STEER_LAYER = 1
    B, T = 2, 8

    key = jax.random.PRNGKey(0)
    k_params, k_idx = jax.random.split(key)
    params = init_params(
        k_params, vocab=VOCAB, block_size=BLOCK_SIZE,
        n_layer=N_LAYER, n_embd=N_EMBD,
    )
    idx = jax.random.randint(k_idx, (B, T), 0, VOCAB, dtype=jnp.int32)

    fwd = jax.jit(
        functools.partial(
            gpt_with_activation_addition_forward,
            n_head=N_HEAD, steer_layer=STEER_LAYER,
        )
    )
    logits = fwd(params, idx)
    jax.block_until_ready(logits)
    assert logits.shape == (B, T, VOCAB) and logits.dtype == jnp.float32
    print("KERNEL_OK")
</pallas_src>

<mosaic_0001>
module attributes {stable_mosaic.version = 11 : i64} {
  func.func @_ln_matmul_kernel(%arg0: i32, %arg1: i32, %arg2: memref<16x32xf32, #tpu.memory_space<vmem>>, %arg3: memref<1x32xf32, #tpu.memory_space<vmem>>, %arg4: memref<1x32xf32, #tpu.memory_space<vmem>>, %arg5: memref<32x96xbf16, #tpu.memory_space<vmem>>, %arg6: memref<1x96xf32, #tpu.memory_space<vmem>>, %arg7: memref<16x96xf32, #tpu.memory_space<vmem>>) attributes {dimension_semantics = [#tpu.dimension_semantics<parallel>, #tpu.dimension_semantics<parallel>], iteration_bounds = array<i64: 1, 1>, scalar_prefetch = 0 : i64, scratch_operands = 0 : i64, tpu.core_type = #tpu.core_type<tc>, window_params = [{transform_indices = @transform_0, window_bounds = array<i64: 16, 32>}, {pipeline_mode = #tpu.pipeline_mode<synchronous>, transform_indices = @transform_1, window_bounds = array<i64: 1, 32>}, {pipeline_mode = #tpu.pipeline_mode<synchronous>, transform_indices = @transform_2, window_bounds = array<i64: 1, 32>}, {transform_indices = @transform_3, window_bounds = array<i64: 32, 96>}, {transform_indices = @transform_4, window_bounds = array<i64: 1, 96>}, {transform_indices = @transform_5, window_bounds = array<i64: 16, 96>}]} {
    %c0 = arith.constant 0 : index
    %c0_0 = arith.constant 0 : index
    %0 = vector.load %arg2[%c0, %c0_0] : memref<16x32xf32, #tpu.memory_space<vmem>>, vector<16x32xf32>
    %cst = arith.constant dense<0.000000e+00> : vector<16xf32>
    %1 = vector.multi_reduction <add>, %0, %cst [1] : vector<16x32xf32> to vector<16xf32>
    %2 = vector.shape_cast %1 : vector<16xf32> to vector<16x1xf32>
    %cst_1 = arith.constant 3.200000e+01 : f32
    %3 = vector.broadcast %cst_1 : f32 to vector<16x1xf32>
    %4 = arith.divf %2, %3 : vector<16x1xf32>
    %5 = vector.broadcast %4 : vector<16x1xf32> to vector<16x32xf32>
    %6 = arith.subf %0, %5 : vector<16x32xf32>
    %7 = arith.mulf %6, %6 : vector<16x32xf32>
    %cst_2 = arith.constant dense<0.000000e+00> : vector<16xf32>
    %8 = vector.multi_reduction <add>, %7, %cst_2 [1] : vector<16x32xf32> to vector<16xf32>
    %9 = vector.shape_cast %8 : vector<16xf32> to vector<16x1xf32>
    %cst_3 = arith.constant 3.200000e+01 : f32
    %10 = vector.broadcast %cst_3 : f32 to vector<16x1xf32>
    %11 = arith.divf %9, %10 : vector<16x1xf32>
    %cst_4 = arith.constant 9.99999974E-6 : f32
    %12 = vector.broadcast %cst_4 : f32 to vector<16x1xf32>
    %13 = arith.addf %11, %12 : vector<16x1xf32>
    %14 = math.rsqrt %13 : vector<16x1xf32>
    %15 = vector.broadcast %14 : vector<16x1xf32> to vector<16x32xf32>
    %16 = arith.mulf %6, %15 : vector<16x32xf32>
    %c0_5 = arith.constant 0 : index
    %c0_6 = arith.constant 0 : index
    %17 = vector.load %arg3[%c0_5, %c0_6] : memref<1x32xf32, #tpu.memory_space<vmem>>, vector<1x32xf32>
    %18 = vector.broadcast %17 : vector<1x32xf32> to vector<16x32xf32>
    %19 = arith.mulf %16, %18 : vector<16x32xf32>
    %c0_7 = arith.constant 0 : index
    %c0_8 = arith.constant 0 : index
    %20 = vector.load %arg4[%c0_7, %c0_8] : memref<1x32xf32, #tpu.memory_space<vmem>>, vector<1x32xf32>
    %21 = vector.broadcast %20 : vector<1x32xf32> to vector<16x32xf32>
    %22 = arith.addf %19, %21 : vector<16x32xf32>
    %23 = arith.truncf %22 : vector<16x32xf32> to vector<16x32xbf16>
    %c0_9 = arith.constant 0 : index
    %c0_10 = arith.constant 0 : index
    %24 = vector.load %arg5[%c0_9, %c0_10] : memref<32x96xbf16, #tpu.memory_space<vmem>>, vector<32x96xbf16>
    %cst_11 = arith.constant dense<0.000000e+00> : vector<16x96xf32>
    %25 = tpu.matmul %23, %24, %cst_11 {dimension_numbers = #tpu.dot_dimension_numbers<[1], [0], [0], [1], [0, 0, 1, 1], [], []>} : vector<16x32xbf16>, vector<32x96xbf16>, vector<16x96xf32> -> vector<16x96xf32>
    %c0_12 = arith.constant 0 : index
    %c0_13 = arith.constant 0 : index
    %26 = vector.load %arg6[%c0_12, %c0_13] : memref<1x96xf32, #tpu.memory_space<vmem>>, vector<1x96xf32>
    %27 = vector.broadcast %26 : vector<1x96xf32> to vector<16x96xf32>
    %28 = arith.addf %25, %27 : vector<16x96xf32>
    %c0_14 = arith.constant 0 : index
    %c0_15 = arith.constant 0 : index
    %29 = vector.load %arg7[%c0_14, %c0_15] : memref<16x96xf32, #tpu.memory_space<vmem>>, vector<16x96xf32>
    tpu.vector_store %arg7[%c0_14, %c0_15], %28 {strides = array<i32>} : memref<16x96xf32, #tpu.memory_space<vmem>>, vector<16x96xf32>,
    return
  }
  func.func @transform_0(%arg0: i32, %arg1: i32) -> (i32, i32) {
    %c0_i32 = arith.constant 0 : i32
    %c0_i32_0 = arith.constant 0 : i32
    return %arg0, %c0_i32 : i32, i32
  }
  func.func @transform_1(%arg0: i32, %arg1: i32) -> (i32, i32) {
    %c0_i32 = arith.constant 0 : i32
    %c0_i32_0 = arith.constant 0 : i32
    %c0_i32_1 = arith.constant 0 : i32
    return %c0_i32, %c0_i32_0 : i32, i32
  }
  func.func @transform_2(%arg0: i32, %arg1: i32) -> (i32, i32) {
    %c0_i32 = arith.constant 0 : i32
    %c0_i32_0 = arith.constant 0 : i32
    %c0_i32_1 = arith.constant 0 : i32
    return %c0_i32, %c0_i32_0 : i32, i32
  }
  func.func @transform_3(%arg0: i32, %arg1: i32) -> (i32, i32) {
    %c0_i32 = arith.constant 0 : i32
    %c0_i32_0 = arith.constant 0 : i32
    return %c0_i32, %arg1 : i32, i32
  }
  func.func @transform_4(%arg0: i32, %arg1: i32) -> (i32, i32) {
    %c0_i32 = arith.constant 0 : i32
    %c0_i32_0 = arith.constant 0 : i32
    return %c0_i32, %arg1 : i32, i32
  }
  func.func @transform_5(%arg0: i32, %arg1: i32) -> (i32, i32) {
    %c0_i32 = arith.constant 0 : i32
    return %arg0, %arg1 : i32, i32
  }
}

module attributes {stable_mosaic.version = 11 : i64} {
  func.func @_attn_kernel(%arg0: i32, %arg1: memref<1x8x96xf32, #tpu.memory_space<vmem>>, %arg2: memref<1x8x32xf32, #tpu.memory_space<vmem>>) attributes {dimension_semantics = [#tpu.dimension_semantics<parallel>], iteration_bounds = array<i64: 2>, scalar_prefetch = 0 : i64, scratch_operands = 0 : i64, tpu.core_type = #tpu.core_type<tc>, window_params = [{transform_indices = @transform_0, window_bounds = array<i64: 1, 8, 96>}, {transform_indices = @transform_1, window_bounds = array<i64: 1, 8, 32>}]} {
    %c0 = arith.constant 0 : index
    %c0_0 = arith.constant 0 : index
    %c0_1 = arith.constant 0 : index
    %0 = vector.load %arg1[%c0, %c0_0, %c0_1] : memref<1x8x96xf32, #tpu.memory_space<vmem>>, vector<1x8x96xf32>
    %1 = vector.shape_cast %0 : vector<1x8x96xf32> to vector<8x96xf32>
    %2 = arith.truncf %1 : vector<8x96xf32> to vector<8x96xbf16>
    %3 = tpu.iota {dimensions = array<i32: 0>} : vector<8x8xi32>
    %4 = tpu.iota {dimensions = array<i32: 1>} : vector<8x8xi32>
    %5 = arith.cmpi sle, %4, %3 : vector<8x8xi32>
    %6 = vector.extract_strided_slice %2 {offsets = [0, 0], sizes = [8, 16], strides = [1, 1]} : vector<8x96xbf16> to vector<8x16xbf16>
    %7 = vector.extract_strided_slice %2 {offsets = [0, 32], sizes = [8, 16], strides = [1, 1]} : vector<8x96xbf16> to vector<8x16xbf16>
    %8 = vector.extract_strided_slice %2 {offsets = [0, 64], sizes = [8, 16], strides = [1, 1]} : vector<8x96xbf16> to vector<8x16xbf16>
    %cst = arith.constant dense<0.000000e+00> : vector<8x8xf32>
    %9 = tpu.matmul %6, %7, %cst {dimension_numbers = #tpu.dot_dimension_numbers<[1], [1], [0], [0], [0, 0, 1, 0], [], []>} : vector<8x16xbf16>, vector<8x16xbf16>, vector<8x8xf32> -> vector<8x8xf32>
    %cst_2 = arith.constant 2.500000e-01 : f32
    %10 = vector.broadcast %cst_2 : f32 to vector<8x8xf32>
    %11 = arith.mulf %9, %10 : vector<8x8xf32>
    %cst_3 = arith.constant -1.000000e+30 : f32
    %12 = vector.broadcast %cst_3 : f32 to vector<8x8xf32>
    %13 = arith.select %5, %11, %12 : vector<8x8xi1>, vector<8x8xf32>
    %cst_4 = arith.constant dense<0xFF800000> : vector<8xf32>
    %14 = vector.multi_reduction <maximumf>, %13, %cst_4 [1] : vector<8x8xf32> to vector<8xf32>
    %15 = vector.shape_cast %14 : vector<8xf32> to vector<8x1xf32>
    %16 = vector.broadcast %15 : vector<8x1xf32> to vector<8x8xf32>
    %17 = arith.subf %13, %16 : vector<8x8xf32>
    %18 = math.exp %17 : vector<8x8xf32>
    %cst_5 = arith.constant dense<0.000000e+00> : vector<8xf32>
    %19 = vector.multi_reduction <add>, %18, %cst_5 [1] : vector<8x8xf32> to vector<8xf32>
    %20 = vector.shape_cast %19 : vector<8xf32> to vector<8x1xf32>
    %21 = tpu.reciprocal %20 {approx = true} : vector<8x1xf32> -> vector<8x1xf32>
    %22 = vector.broadcast %21 : vector<8x1xf32> to vector<8x8xf32>
    %23 = arith.mulf %18, %22 : vector<8x8xf32>
    %24 = arith.truncf %23 : vector<8x8xf32> to vector<8x8xbf16>
    %cst_6 = arith.constant dense<0.000000e+00> : vector<8x16xf32>
    %25 = tpu.matmul %24, %8, %cst_6 {dimension_numbers = #tpu.dot_dimension_numbers<[1], [0], [0], [1], [0, 0, 1, 1], [], []>} : vector<8x8xbf16>, vector<8x16xbf16>, vector<8x16xf32> -> vector<8x16xf32>
    %26 = vector.extract_strided_slice %2 {offsets = [0, 16], sizes = [8, 16], strides = [1, 1]} : vector<8x96xbf16> to vector<8x16xbf16>
    %27 = vector.extract_strided_slice %2 {offsets = [0, 48], sizes = [8, 16], strides = [1, 1]} : vector<8x96xbf16> to vector<8x16xbf16>
    %28 = vector.extract_strided_slice %2 {offsets = [0, 80], sizes = [8, 16], strides = [1, 1]} : vector<8x96xbf16> to vector<8x16xbf16>
    %cst_7 = arith.constant dense<0.000000e+00> : vector<8x8xf32>
    %29 = tpu.matmul %26, %27, %cst_7 {dimension_numbers = #tpu.dot_dimension_numbers<[1], [1], [0], [0], [0, 0, 1, 0], [], []>} : vector<8x16xbf16>, vector<8x16xbf16>, vector<8x8xf32> -> vector<8x8xf32>
    %cst_8 = arith.constant 2.500000e-01 : f32
    %30 = vector.broadcast %cst_8 : f32 to vector<8x8xf32>
    %31 = arith.mulf %29, %30 : vector<8x8xf32>
    %cst_9 = arith.constant -1.000000e+30 : f32
    %32 = vector.broadcast %cst_9 : f32 to vector<8x8xf32>
    %33 = arith.select %5, %31, %32 : vector<8x8xi1>, vector<8x8xf32>
    %cst_10 = arith.constant dense<0xFF800000> : vector<8xf32>
    %34 = vector.multi_reduction <maximumf>, %33, %cst_10 [1] : vector<8x8xf32> to vector<8xf32>
    %35 = vector.shape_cast %34 : vector<8xf32> to vector<8x1xf32>
    %36 = vector.broadcast %35 : vector<8x1xf32> to vector<8x8xf32>
    %37 = arith.subf %33, %36 : vector<8x8xf32>
    %38 = math.exp %37 : vector<8x8xf32>
    %cst_11 = arith.constant dense<0.000000e+00> : vector<8xf32>
    %39 = vector.multi_reduction <add>, %38, %cst_11 [1] : vector<8x8xf32> to vector<8xf32>
    %40 = vector.shape_cast %39 : vector<8xf32> to vector<8x1xf32>
    %41 = tpu.reciprocal %40 {approx = true} : vector<8x1xf32> -> vector<8x1xf32>
    %42 = vector.broadcast %41 : vector<8x1xf32> to vector<8x8xf32>
    %43 = arith.mulf %38, %42 : vector<8x8xf32>
    %44 = arith.truncf %43 : vector<8x8xf32> to vector<8x8xbf16>
    %cst_12 = arith.constant dense<0.000000e+00> : vector<8x16xf32>
    %45 = tpu.matmul %44, %28, %cst_12 {dimension_numbers = #tpu.dot_dimension_numbers<[1], [0], [0], [1], [0, 0, 1, 1], [], []>} : vector<8x8xbf16>, vector<8x16xbf16>, vector<8x16xf32> -> vector<8x16xf32>
    %46 = tpu.concatenate %25, %45 in 1 : vector<8x16xf32>, vector<8x16xf32> -> vector<8x32xf32>
    %c0_13 = arith.constant 0 : index
    %c0_14 = arith.constant 0 : index
    %c0_15 = arith.constant 0 : index
    %47 = vector.load %arg2[%c0_13, %c0_14, %c0_15] : memref<1x8x32xf32, #tpu.memory_space<vmem>>, vector<1x8x32xf32>
    %48 = vector.shape_cast %47 : vector<1x8x32xf32> to vector<8x32xf32>
    %49 = vector.shape_cast %46 : vector<8x32xf32> to vector<1x8x32xf32>
    tpu.vector_store %arg2[%c0_13, %c0_14, %c0_15], %49 {strides = array<i32>} : memref<1x8x32xf32, #tpu.memory_space<vmem>>, vector<1x8x32xf32>,
    return
  }
  func.func @transform_0(%arg0: i32) -> (i32, i32, i32) {
    %c0_i32 = arith.constant 0 : i32
    %c0_i32_0 = arith.constant 0 : i32
    %c0_i32_1 = arith.constant 0 : i32
    return %arg0, %c0_i32, %c0_i32_0 : i32, i32, i32
  }
  func.func @transform_1(%arg0: i32) -> (i32, i32, i32) {
    %c0_i32 = arith.constant 0 : i32
    %c0_i32_0 = arith.constant 0 : i32
    %c0_i32_1 = arith.constant 0 : i32
    return %arg0, %c0_i32, %c0_i32_0 : i32, i32, i32
  }
}

module attributes {stable_mosaic.version = 11 : i64} {
  func.func @_matmul_res_kernel(%arg0: i32, %arg1: i32, %arg2: i32, %arg3: memref<16x32xf32, #tpu.memory_space<vmem>>, %arg4: memref<32x32xbf16, #tpu.memory_space<vmem>>, %arg5: memref<1x32xf32, #tpu.memory_space<vmem>>, %arg6: memref<16x32xf32, #tpu.memory_space<vmem>>, %arg7: memref<16x32xf32, #tpu.memory_space<vmem>>, %arg8: memref<16x32xf32, #tpu.memory_space<vmem>>) attributes {dimension_semantics = [#tpu.dimension_semantics<parallel>, #tpu.dimension_semantics<parallel>, #tpu.dimension_semantics<arbitrary>], iteration_bounds = array<i64: 1, 1, 1>, scalar_prefetch = 0 : i64, scratch_operands = 1 : i64, tpu.core_type = #tpu.core_type<tc>, window_params = [{transform_indices = @transform_0, window_bounds = array<i64: 16, 32>}, {transform_indices = @transform_1, window_bounds = array<i64: 32, 32>}, {transform_indices = @transform_2, window_bounds = array<i64: 1, 32>}, {transform_indices = @transform_3, window_bounds = array<i64: 16, 32>}, {transform_indices = @transform_4, window_bounds = array<i64: 16, 32>}]} {
    %c0_i32 = arith.constant 0 : i32
    %0 = arith.cmpi eq, %arg2, %c0_i32 : i32
    %1 = arith.extui %0 : i1 to i32
    %c0_i32_0 = arith.constant 0 : i32
    %2 = arith.cmpi ne, %1, %c0_i32_0 : i32
    scf.if %2 {
      %cst_10 = arith.constant 0.000000e+00 : f32
      %13 = vector.broadcast %cst_10 : f32 to vector<16x32xf32>
      %c0_11 = arith.constant 0 : index
      %c0_12 = arith.constant 0 : index
      %14 = vector.load %arg8[%c0_11, %c0_12] : memref<16x32xf32, #tpu.memory_space<vmem>>, vector<16x32xf32>
      tpu.vector_store %arg8[%c0_11, %c0_12], %13 {strides = array<i32>} : memref<16x32xf32, #tpu.memory_space<vmem>>, vector<16x32xf32>,
    } else {
    }
    %c0 = arith.constant 0 : index
    %c0_1 = arith.constant 0 : index
    %3 = vector.load %arg8[%c0, %c0_1] : memref<16x32xf32, #tpu.memory_space<vmem>>, vector<16x32xf32>
    %c0_2 = arith.constant 0 : index
    %c0_3 = arith.constant 0 : index
    %4 = vector.load %arg3[%c0_2, %c0_3] : memref<16x32xf32, #tpu.memory_space<vmem>>, vector<16x32xf32>
    %5 = arith.truncf %4 : vector<16x32xf32> to vector<16x32xbf16>
    %c0_4 = arith.constant 0 : index
    %c0_5 = arith.constant 0 : index
    %6 = vector.load %arg4[%c0_4, %c0_5] : memref<32x32xbf16, #tpu.memory_space<vmem>>, vector<32x32xbf16>
    %cst = arith.constant dense<0.000000e+00> : vector<16x32xf32>
    %7 = tpu.matmul %5, %6, %cst {dimension_numbers = #tpu.dot_dimension_numbers<[1], [0], [0], [1], [0, 0, 1, 1], [], []>} : vector<16x32xbf16>, vector<32x32xbf16>, vector<16x32xf32> -> vector<16x32xf32>
    %8 = arith.addf %3, %7 : vector<16x32xf32>
    %c0_6 = arith.constant 0 : index
    %c0_7 = arith.constant 0 : index
    %9 = vector.load %arg8[%c0_6, %c0_7] : memref<16x32xf32, #tpu.memory_space<vmem>>, vector<16x32xf32>
    tpu.vector_store %arg8[%c0_6, %c0_7], %8 {strides = array<i32>} : memref<16x32xf32, #tpu.memory_space<vmem>>, vector<16x32xf32>,
    %c0_i32_8 = arith.constant 0 : i32
    %10 = arith.cmpi eq, %arg2, %c0_i32_8 : i32
    %11 = arith.extui %10 : i1 to i32
    %c0_i32_9 = arith.constant 0 : i32
    %12 = arith.cmpi ne, %11, %c0_i32_9 : i32
    scf.if %12 {
      %c0_10 = arith.constant 0 : index
      %c0_11 = arith.constant 0 : index
      %13 = vector.load %arg8[%c0_10, %c0_11] : memref<16x32xf32, #tpu.memory_space<vmem>>, vector<16x32xf32>
      %c0_12 = arith.constant 0 : index
      %c0_13 = arith.constant 0 : index
      %14 = vector.load %arg5[%c0_12, %c0_13] : memref<1x32xf32, #tpu.memory_space<vmem>>, vector<1x32xf32>
      %15 = vector.broadcast %14 : vector<1x32xf32> to vector<16x32xf32>
      %16 = arith.addf %13, %15 : vector<16x32xf32>
      %c0_14 = arith.constant 0 : index
      %c0_15 = arith.constant 0 : index
      %17 = vector.load %arg6[%c0_14, %c0_15] : memref<16x32xf32, #tpu.memory_space<vmem>>, vector<16x32xf32>
      %18 = arith.addf %16, %17 : vector<16x32xf32>
      %c0_16 = arith.constant 0 : index
      %c0_17 = arith.constant 0 : index
      %19 = vector.load %arg7[%c0_16, %c0_17] : memref<16x32xf32, #tpu.memory_space<vmem>>, vector<16x32xf32>
      tpu.vector_store %arg7[%c0_16, %c0_17], %18 {strides = array<i32>} : memref<16x32xf32, #tpu.memory_space<vmem>>, vector<16x32xf32>,
    } else {
    }
    return
  }
  func.func @transform_0(%arg0: i32, %arg1: i32, %arg2: i32) -> (i32, i32) {
    %c0_i32 = arith.constant 0 : i32
    return %arg0, %arg2 : i32, i32
  }
  func.func @transform_1(%arg0: i32, %arg1: i32, %arg2: i32) -> (i32, i32) {
    %c0_i32 = arith.constant 0 : i32
    return %arg2, %arg1 : i32, i32
  }
  func.func @transform_2(%arg0: i32, %arg1: i32, %arg2: i32) -> (i32, i32) {
    %c0_i32 = arith.constant 0 : i32
    %c0_i32_0 = arith.constant 0 : i32
    return %c0_i32, %arg1 : i32, i32
  }
  func.func @transform_3(%arg0: i32, %arg1: i32, %arg2: i32) -> (i32, i32) {
    %c0_i32 = arith.constant 0 : i32
    return %arg0, %arg1 : i32, i32
  }
  func.func @transform_4(%arg0: i32, %arg1: i32, %arg2: i32) -> (i32, i32) {
    %c0_i32 = arith.constant 0 : i32
    return %arg0, %arg1 : i32, i32
  }
}

module attributes {stable_mosaic.version = 11 : i64} {
  func.func @_ln_matmul_kernel(%arg0: i32, %arg1: i32, %arg2: memref<16x32xf32, #tpu.memory_space<vmem>>, %arg3: memref<1x32xf32, #tpu.memory_space<vmem>>, %arg4: memref<1x32xf32, #tpu.memory_space<vmem>>, %arg5: memref<32x128xbf16, #tpu.memory_space<vmem>>, %arg6: memref<1x128xf32, #tpu.memory_space<vmem>>, %arg7: memref<16x128xf32, #tpu.memory_space<vmem>>) attributes {dimension_semantics = [#tpu.dimension_semantics<parallel>, #tpu.dimension_semantics<parallel>], iteration_bounds = array<i64: 1, 1>, scalar_prefetch = 0 : i64, scratch_operands = 0 : i64, tpu.core_type = #tpu.core_type<tc>, window_params = [{transform_indices = @transform_0, window_bounds = array<i64: 16, 32>}, {pipeline_mode = #tpu.pipeline_mode<synchronous>, transform_indices = @transform_1, window_bounds = array<i64: 1, 32>}, {pipeline_mode = #tpu.pipeline_mode<synchronous>, transform_indices = @transform_2, window_bounds = array<i64: 1, 32>}, {transform_indices = @transform_3, window_bounds = array<i64: 32, 128>}, {transform_indices = @transform_4, window_bounds = array<i64: 1, 128>}, {transform_indices = @transform_5, window_bounds = array<i64: 16, 128>}]} {
    %c0 = arith.constant 0 : index
    %c0_0 = arith.constant 0 : index
    %0 = vector.load %arg2[%c0, %c0_0] : memref<16x32xf32, #tpu.memory_space<vmem>>, vector<16x32xf32>
    %cst = arith.constant dense<0.000000e+00> : vector<16xf32>
    %1 = vector.multi_reduction <add>, %0, %cst [1] : vector<16x32xf32> to vector<16xf32>
    %2 = vector.shape_cast %1 : vector<16xf32> to vector<16x1xf32>
    %cst_1 = arith.constant 3.200000e+01 : f32
    %3 = vector.broadcast %cst_1 : f32 to vector<16x1xf32>
    %4 = arith.divf %2, %3 : vector<16x1xf32>
    %5 = vector.broadcast %4 : vector<16x1xf32> to vector<16x32xf32>
    %6 = arith.subf %0, %5 : vector<16x32xf32>
    %7 = arith.mulf %6, %6 : vector<16x32xf32>
    %cst_2 = arith.constant dense<0.000000e+00> : vector<16xf32>
    %8 = vector.multi_reduction <add>, %7, %cst_2 [1] : vector<16x32xf32> to vector<16xf32>
    %9 = vector.shape_cast %8 : vector<16xf32> to vector<16x1xf32>
    %cst_3 = arith.constant 3.200000e+01 : f32
    %10 = vector.broadcast %cst_3 : f32 to vector<16x1xf32>
    %11 = arith.divf %9, %10 : vector<16x1xf32>
    %cst_4 = arith.constant 9.99999974E-6 : f32
    %12 = vector.broadcast %cst_4 : f32 to vector<16x1xf32>
    %13 = arith.addf %11, %12 : vector<16x1xf32>
    %14 = math.rsqrt %13 : vector<16x1xf32>
    %15 = vector.broadcast %14 : vector<16x1xf32> to vector<16x32xf32>
    %16 = arith.mulf %6, %15 : vector<16x32xf32>
    %c0_5 = arith.constant 0 : index
    %c0_6 = arith.constant 0 : index
    %17 = vector.load %arg3[%c0_5, %c0_6] : memref<1x32xf32, #tpu.memory_space<vmem>>, vector<1x32xf32>
    %18 = vector.broadcast %17 : vector<1x32xf32> to vector<16x32xf32>
    %19 = arith.mulf %16, %18 : vector<16x32xf32>
    %c0_7 = arith.constant 0 : index
    %c0_8 = arith.constant 0 : index
    %20 = vector.load %arg4[%c0_7, %c0_8] : memref<1x32xf32, #tpu.memory_space<vmem>>, vector<1x32xf32>
    %21 = vector.broadcast %20 : vector<1x32xf32> to vector<16x32xf32>
    %22 = arith.addf %19, %21 : vector<16x32xf32>
    %23 = arith.truncf %22 : vector<16x32xf32> to vector<16x32xbf16>
    %c0_9 = arith.constant 0 : index
    %c0_10 = arith.constant 0 : index
    %24 = vector.load %arg5[%c0_9, %c0_10] : memref<32x128xbf16, #tpu.memory_space<vmem>>, vector<32x128xbf16>
    %cst_11 = arith.constant dense<0.000000e+00> : vector<16x128xf32>
    %25 = tpu.matmul %23, %24, %cst_11 {dimension_numbers = #tpu.dot_dimension_numbers<[1], [0], [0], [1], [0, 0, 1, 1], [], []>} : vector<16x32xbf16>, vector<32x128xbf16>, vector<16x128xf32> -> vector<16x128xf32>
    %c0_12 = arith.constant 0 : index
    %c0_13 = arith.constant 0 : index
    %26 = vector.load %arg6[%c0_12, %c0_13] : memref<1x128xf32, #tpu.memory_space<vmem>>, vector<1x128xf32>
    %27 = vector.broadcast %26 : vector<1x128xf32> to vector<16x128xf32>
    %28 = arith.addf %25, %27 : vector<16x128xf32>
    %cst_14 = arith.constant 5.000000e-01 : f32
    %29 = vector.broadcast %cst_14 : f32 to vector<16x128xf32>
    %30 = arith.mulf %29, %28 : vector<16x128xf32>
    %cst_15 = arith.constant 4.471500e-02 : f32
    %31 = vector.broadcast %cst_15 : f32 to vector<16x128xf32>
    %32 = arith.mulf %31, %28 : vector<16x128xf32>
    %33 = arith.mulf %32, %28 : vector<16x128xf32>
    %34 = arith.mulf %33, %28 : vector<16x128xf32>
    %35 = arith.addf %28, %34 : vector<16x128xf32>
    %cst_16 = arith.constant 0.797884583 : f32
    %36 = vector.broadcast %cst_16 : f32 to vector<16x128xf32>
    %37 = arith.mulf %36, %35 : vector<16x128xf32>
    %38 = math.tanh %37 : vector<16x128xf32>
    %cst_17 = arith.constant 1.000000e+00 : f32
    %39 = vector.broadcast %cst_17 : f32 to vector<16x128xf32>
    %40 = arith.addf %39, %38 : vector<16x128xf32>
    %41 = arith.mulf %30, %40 : vector<16x128xf32>
    %c0_18 = arith.constant 0 : index
    %c0_19 = arith.constant 0 : index
    %42 = vector.load %arg7[%c0_18, %c0_19] : memref<16x128xf32, #tpu.memory_space<vmem>>, vector<16x128xf32>
    tpu.vector_store %arg7[%c0_18, %c0_19], %41 {strides = array<i32>} : memref<16x128xf32, #tpu.memory_space<vmem>>, vector<16x128xf32>,
    return
  }
  func.func @transform_0(%arg0: i32, %arg1: i32) -> (i32, i32) {
    %c0_i32 = arith.constant 0 : i32
    %c0_i32_0 = arith.constant 0 : i32
    return %arg0, %c0_i32 : i32, i32
  }
  func.func @transform_1(%arg0: i32, %arg1: i32) -> (i32, i32) {
    %c0_i32 = arith.constant 0 : i32
    %c0_i32_0 = arith.constant 0 : i32
    %c0_i32_1 = arith.constant 0 : i32
    return %c0_i32, %c0_i32_0 : i32, i32
  }
  func.func @transform_2(%arg0: i32, %arg1: i32) -> (i32, i32) {
    %c0_i32 = arith.constant 0 : i32
    %c0_i32_0 = arith.constant 0 : i32
    %c0_i32_1 = arith.constant 0 : i32
    return %c0_i32, %c0_i32_0 : i32, i32
  }
  func.func @transform_3(%arg0: i32, %arg1: i32) -> (i32, i32) {
    %c0_i32 = arith.constant 0 : i32
    %c0_i32_0 = arith.constant 0 : i32
    return %c0_i32, %arg1 : i32, i32
  }
  func.func @transform_4(%arg0: i32, %arg1: i32) -> (i32, i32) {
    %c0_i32 = arith.constant 0 : i32
    %c0_i32_0 = arith.constant 0 : i32
    return %c0_i32, %arg1 : i32, i32
  }
  func.func @transform_5(%arg0: i32, %arg1: i32) -> (i32, i32) {
    %c0_i32 = arith.constant 0 : i32
    return %arg0, %arg1 : i32, i32
  }
}

module attributes {stable_mosaic.version = 11 : i64} {
  func.func @_add_row_kernel(%arg0: i32, %arg1: memref<16x32xf32, #tpu.memory_space<vmem>>, %arg2: memref<1x32xf32, #tpu.memory_space<vmem>>, %arg3: memref<16x32xf32, #tpu.memory_space<vmem>>) attributes {dimension_semantics = [#tpu.dimension_semantics<parallel>], iteration_bounds = array<i64: 1>, scalar_prefetch = 0 : i64, scratch_operands = 0 : i64, tpu.core_type = #tpu.core_type<tc>, window_params = [{transform_indices = @transform_0, window_bounds = array<i64: 16, 32>}, {pipeline_mode = #tpu.pipeline_mode<synchronous>, transform_indices = @transform_1, window_bounds = array<i64: 1, 32>}, {transform_indices = @transform_2, window_bounds = array<i64: 16, 32>}]} {
    %c0 = arith.constant 0 : index
    %c0_0 = arith.constant 0 : index
    %0 = vector.load %arg1[%c0, %c0_0] : memref<16x32xf32, #tpu.memory_space<vmem>>, vector<16x32xf32>
    %c0_1 = arith.constant 0 : index
    %c0_2 = arith.constant 0 : index
    %1 = vector.load %arg2[%c0_1, %c0_2] : memref<1x32xf32, #tpu.memory_space<vmem>>, vector<1x32xf32>
    %2 = vector.broadcast %1 : vector<1x32xf32> to vector<16x32xf32>
    %3 = arith.addf %0, %2 : vector<16x32xf32>
    %c0_3 = arith.constant 0 : index
    %c0_4 = arith.constant 0 : index
    %4 = vector.load %arg3[%c0_3, %c0_4] : memref<16x32xf32, #tpu.memory_space<vmem>>, vector<16x32xf32>
    tpu.vector_store %arg3[%c0_3, %c0_4], %3 {strides = array<i32>} : memref<16x32xf32, #tpu.memory_space<vmem>>, vector<16x32xf32>,
    return
  }
  func.func @transform_0(%arg0: i32) -> (i32, i32) {
    %c0_i32 = arith.constant 0 : i32
    %c0_i32_0 = arith.constant 0 : i32
    return %arg0, %c0_i32 : i32, i32
  }
  func.func @transform_1(%arg0: i32) -> (i32, i32) {
    %c0_i32 = arith.constant 0 : i32
    %c0_i32_0 = arith.constant 0 : i32
    %c0_i32_1 = arith.constant 0 : i32
    return %c0_i32, %c0_i32_0 : i32, i32
  }
  func.func @transform_2(%arg0: i32) -> (i32, i32) {
    %c0_i32 = arith.constant 0 : i32
    %c0_i32_0 = arith.constant 0 : i32
    return %arg0, %c0_i32 : i32, i32
  }
}

module attributes {stable_mosaic.version = 11 : i64} {
  func.func @_matmul_res_kernel(%arg0: i32, %arg1: i32, %arg2: i32, %arg3: memref<16x128xf32, #tpu.memory_space<vmem>>, %arg4: memref<128x32xbf16, #tpu.memory_space<vmem>>, %arg5: memref<1x32xf32, #tpu.memory_space<vmem>>, %arg6: memref<16x32xf32, #tpu.memory_space<vmem>>, %arg7: memref<16x32xf32, #tpu.memory_space<vmem>>, %arg8: memref<16x32xf32, #tpu.memory_space<vmem>>) attributes {dimension_semantics = [#tpu.dimension_semantics<parallel>, #tpu.dimension_semantics<parallel>, #tpu.dimension_semantics<arbitrary>], iteration_bounds = array<i64: 1, 1, 1>, scalar_prefetch = 0 : i64, scratch_operands = 1 : i64, tpu.core_type = #tpu.core_type<tc>, window_params = [{transform_indices = @transform_0, window_bounds = array<i64: 16, 128>}, {transform_indices = @transform_1, window_bounds = array<i64: 128, 32>}, {transform_indices = @transform_2, window_bounds = array<i64: 1, 32>}, {transform_indices = @transform_3, window_bounds = array<i64: 16, 32>}, {transform_indices = @transform_4, window_bounds = array<i64: 16, 32>}]} {
    %c0_i32 = arith.constant 0 : i32
    %0 = arith.cmpi eq, %arg2, %c0_i32 : i32
    %1 = arith.extui %0 : i1 to i32
    %c0_i32_0 = arith.constant 0 : i32
    %2 = arith.cmpi ne, %1, %c0_i32_0 : i32
    scf.if %2 {
      %cst_10 = arith.constant 0.000000e+00 : f32
      %13 = vector.broadcast %cst_10 : f32 to vector<16x32xf32>
      %c0_11 = arith.constant 0 : index
      %c0_12 = arith.constant 0 : index
      %14 = vector.load %arg8[%c0_11, %c0_12] : memref<16x32xf32, #tpu.memory_space<vmem>>, vector<16x32xf32>
      tpu.vector_store %arg8[%c0_11, %c0_12], %13 {strides = array<i32>} : memref<16x32xf32, #tpu.memory_space<vmem>>, vector<16x32xf32>,
    } else {
    }
    %c0 = arith.constant 0 : index
    %c0_1 = arith.constant 0 : index
    %3 = vector.load %arg8[%c0, %c0_1] : memref<16x32xf32, #tpu.memory_space<vmem>>, vector<16x32xf32>
    %c0_2 = arith.constant 0 : index
    %c0_3 = arith.constant 0 : index
    %4 = vector.load %arg3[%c0_2, %c0_3] : memref<16x128xf32, #tpu.memory_space<vmem>>, vector<16x128xf32>
    %5 = arith.truncf %4 : vector<16x128xf32> to vector<16x128xbf16>
    %c0_4 = arith.constant 0 : index
    %c0_5 = arith.constant 0 : index
    %6 = vector.load %arg4[%c0_4, %c0_5] : memref<128x32xbf16, #tpu.memory_space<vmem>>, vector<128x32xbf16>
    %cst = arith.constant dense<0.000000e+00> : vector<16x32xf32>
    %7 = tpu.matmul %5, %6, %cst {dimension_numbers = #tpu.dot_dimension_numbers<[1], [0], [0], [1], [0, 0, 1, 1], [], []>} : vector<16x128xbf16>, vector<128x32xbf16>, vector<16x32xf32> -> vector<16x32xf32>
    %8 = arith.addf %3, %7 : vector<16x32xf32>
    %c0_6 = arith.constant 0 : index
    %c0_7 = arith.constant 0 : index
    %9 = vector.load %arg8[%c0_6, %c0_7] : memref<16x32xf32, #tpu.memory_space<vmem>>, vector<16x32xf32>
    tpu.vector_store %arg8[%c0_6, %c0_7], %8 {strides = array<i32>} : memref<16x32xf32, #tpu.memory_space<vmem>>, vector<16x32xf32>,
    %c0_i32_8 = arith.constant 0 : i32
    %10 = arith.cmpi eq, %arg2, %c0_i32_8 : i32
    %11 = arith.extui %10 : i1 to i32
    %c0_i32_9 = arith.constant 0 : i32
    %12 = arith.cmpi ne, %11, %c0_i32_9 : i32
    scf.if %12 {
      %c0_10 = arith.constant 0 : index
      %c0_11 = arith.constant 0 : index
      %13 = vector.load %arg8[%c0_10, %c0_11] : memref<16x32xf32, #tpu.memory_space<vmem>>, vector<16x32xf32>
      %c0_12 = arith.constant 0 : index
      %c0_13 = arith.constant 0 : index
      %14 = vector.load %arg5[%c0_12, %c0_13] : memref<1x32xf32, #tpu.memory_space<vmem>>, vector<1x32xf32>
      %15 = vector.broadcast %14 : vector<1x32xf32> to vector<16x32xf32>
      %16 = arith.addf %13, %15 : vector<16x32xf32>
      %c0_14 = arith.constant 0 : index
      %c0_15 = arith.constant 0 : index
      %17 = vector.load %arg6[%c0_14, %c0_15] : memref<16x32xf32, #tpu.memory_space<vmem>>, vector<16x32xf32>
      %18 = arith.addf %16, %17 : vector<16x32xf32>
      %c0_16 = arith.constant 0 : index
      %c0_17 = arith.constant 0 : index
      %19 = vector.load %arg7[%c0_16, %c0_17] : memref<16x32xf32, #tpu.memory_space<vmem>>, vector<16x32xf32>
      tpu.vector_store %arg7[%c0_16, %c0_17], %18 {strides = array<i32>} : memref<16x32xf32, #tpu.memory_space<vmem>>, vector<16x32xf32>,
    } else {
    }
    return
  }
  func.func @transform_0(%arg0: i32, %arg1: i32, %arg2: i32) -> (i32, i32) {
    %c0_i32 = arith.constant 0 : i32
    return %arg0, %arg2 : i32, i32
  }
  func.func @transform_1(%arg0: i32, %arg1: i32, %arg2: i32) -> (i32, i32) {
    %c0_i32 = arith.constant 0 : i32
    return %arg2, %arg1 : i32, i32
  }
  func.func @transform_2(%arg0: i32, %arg1: i32, %arg2: i32) -> (i32, i32) {
    %c0_i32 = arith.constant 0 : i32
    %c0_i32_0 = arith.constant 0 : i32
    return %c0_i32, %arg1 : i32, i32
  }
  func.func @transform_3(%arg0: i32, %arg1: i32, %arg2: i32) -> (i32, i32) {
    %c0_i32 = arith.constant 0 : i32
    return %arg0, %arg1 : i32, i32
  }
  func.func @transform_4(%arg0: i32, %arg1: i32, %arg2: i32) -> (i32, i32) {
    %c0_i32 = arith.constant 0 : i32
    return %arg0, %arg1 : i32, i32
  }
}

module attributes {stable_mosaic.version = 11 : i64} {
  func.func @_lnf_lmhead_kernel(%arg0: i32, %arg1: i32, %arg2: memref<16x32xf32, #tpu.memory_space<vmem>>, %arg3: memref<1x32xf32, #tpu.memory_space<vmem>>, %arg4: memref<1x32xf32, #tpu.memory_space<vmem>>, %arg5: memref<64x32xf32, #tpu.memory_space<vmem>>, %arg6: memref<16x64xf32, #tpu.memory_space<vmem>>) attributes {dimension_semantics = [#tpu.dimension_semantics<parallel>, #tpu.dimension_semantics<parallel>], iteration_bounds = array<i64: 1, 1>, scalar_prefetch = 0 : i64, scratch_operands = 0 : i64, tpu.core_type = #tpu.core_type<tc>, window_params = [{transform_indices = @transform_0, window_bounds = array<i64: 16, 32>}, {pipeline_mode = #tpu.pipeline_mode<synchronous>, transform_indices = @transform_1, window_bounds = array<i64: 1, 32>}, {pipeline_mode = #tpu.pipeline_mode<synchronous>, transform_indices = @transform_2, window_bounds = array<i64: 1, 32>}, {transform_indices = @transform_3, window_bounds = array<i64: 64, 32>}, {transform_indices = @transform_4, window_bounds = array<i64: 16, 64>}]} {
    %c0 = arith.constant 0 : index
    %c0_0 = arith.constant 0 : index
    %0 = vector.load %arg2[%c0, %c0_0] : memref<16x32xf32, #tpu.memory_space<vmem>>, vector<16x32xf32>
    %cst = arith.constant dense<0.000000e+00> : vector<16xf32>
    %1 = vector.multi_reduction <add>, %0, %cst [1] : vector<16x32xf32> to vector<16xf32>
    %2 = vector.shape_cast %1 : vector<16xf32> to vector<16x1xf32>
    %cst_1 = arith.constant 3.200000e+01 : f32
    %3 = vector.broadcast %cst_1 : f32 to vector<16x1xf32>
    %4 = arith.divf %2, %3 : vector<16x1xf32>
    %5 = vector.broadcast %4 : vector<16x1xf32> to vector<16x32xf32>
    %6 = arith.subf %0, %5 : vector<16x32xf32>
    %7 = arith.mulf %6, %6 : vector<16x32xf32>
    %cst_2 = arith.constant dense<0.000000e+00> : vector<16xf32>
    %8 = vector.multi_reduction <add>, %7, %cst_2 [1] : vector<16x32xf32> to vector<16xf32>
    %9 = vector.shape_cast %8 : vector<16xf32> to vector<16x1xf32>
    %cst_3 = arith.constant 3.200000e+01 : f32
    %10 = vector.broadcast %cst_3 : f32 to vector<16x1xf32>
    %11 = arith.divf %9, %10 : vector<16x1xf32>
    %cst_4 = arith.constant 9.99999974E-6 : f32
    %12 = vector.broadcast %cst_4 : f32 to vector<16x1xf32>
    %13 = arith.addf %11, %12 : vector<16x1xf32>
    %14 = math.rsqrt %13 : vector<16x1xf32>
    %15 = vector.broadcast %14 : vector<16x1xf32> to vector<16x32xf32>
    %16 = arith.mulf %6, %15 : vector<16x32xf32>
    %c0_5 = arith.constant 0 : index
    %c0_6 = arith.constant 0 : index
    %17 = vector.load %arg3[%c0_5, %c0_6] : memref<1x32xf32, #tpu.memory_space<vmem>>, vector<1x32xf32>
    %18 = vector.broadcast %17 : vector<1x32xf32> to vector<16x32xf32>
    %19 = arith.mulf %16, %18 : vector<16x32xf32>
    %c0_7 = arith.constant 0 : index
    %c0_8 = arith.constant 0 : index
    %20 = vector.load %arg4[%c0_7, %c0_8] : memref<1x32xf32, #tpu.memory_space<vmem>>, vector<1x32xf32>
    %21 = vector.broadcast %20 : vector<1x32xf32> to vector<16x32xf32>
    %22 = arith.addf %19, %21 : vector<16x32xf32>
    %23 = arith.truncf %22 : vector<16x32xf32> to vector<16x32xbf16>
    %c0_9 = arith.constant 0 : index
    %c0_10 = arith.constant 0 : index
    %24 = vector.load %arg5[%c0_9, %c0_10] : memref<64x32xf32, #tpu.memory_space<vmem>>, vector<64x32xf32>
    %25 = arith.truncf %24 : vector<64x32xf32> to vector<64x32xbf16>
    %cst_11 = arith.constant dense<0.000000e+00> : vector<16x64xf32>
    %26 = tpu.matmul %23, %25, %cst_11 {dimension_numbers = #tpu.dot_dimension_numbers<[1], [1], [0], [0], [0, 0, 1, 0], [], []>} : vector<16x32xbf16>, vector<64x32xbf16>, vector<16x64xf32> -> vector<16x64xf32>
    %c0_12 = arith.constant 0 : index
    %c0_13 = arith.constant 0 : index
    %27 = vector.load %arg6[%c0_12, %c0_13] : memref<16x64xf32, #tpu.memory_space<vmem>>, vector<16x64xf32>
    tpu.vector_store %arg6[%c0_12, %c0_13], %26 {strides = array<i32>} : memref<16x64xf32, #tpu.memory_space<vmem>>, vector<16x64xf32>,
    return
  }
  func.func @transform_0(%arg0: i32, %arg1: i32) -> (i32, i32) {
    %c0_i32 = arith.constant 0 : i32
    %c0_i32_0 = arith.constant 0 : i32
    return %arg0, %c0_i32 : i32, i32
  }
  func.func @transform_1(%arg0: i32, %arg1: i32) -> (i32, i32) {
    %c0_i32 = arith.constant 0 : i32
    %c0_i32_0 = arith.constant 0 : i32
    %c0_i32_1 = arith.constant 0 : i32
    return %c0_i32, %c0_i32_0 : i32, i32
  }
  func.func @transform_2(%arg0: i32, %arg1: i32) -> (i32, i32) {
    %c0_i32 = arith.constant 0 : i32
    %c0_i32_0 = arith.constant 0 : i32
    %c0_i32_1 = arith.constant 0 : i32
    return %c0_i32, %c0_i32_0 : i32, i32
  }
  func.func @transform_3(%arg0: i32, %arg1: i32) -> (i32, i32) {
    %c0_i32 = arith.constant 0 : i32
    %c0_i32_0 = arith.constant 0 : i32
    return %arg1, %c0_i32 : i32, i32
  }
  func.func @transform_4(%arg0: i32, %arg1: i32) -> (i32, i32) {
    %c0_i32 = arith.constant 0 : i32
    return %arg0, %arg1 : i32, i32
  }
}

</mosaic_0001>

<bundles_post_ra>
// kernel: gpt_with_activation_addition_forward.14
= control target key start
LH: loop header
LB: loop body
LE: loop exit
PB: predicated region body
PF: predicated region fallthrough
CT: control target
= control target key end

     0   :  { %vm22_vm0 = vcmask 261120   ;;  %v138_v0 = vmov 0.0   ;;  %vm139_vm1 = vmmov 0   ;;  %s199_s1 = inlined_call_operand.vmem [shape: bf16[32,32], index: 1, kind: input, shape index: {}]   ;;  %s200_s0 = inlined_call_operand.vmem [shape: f32[16,32], index: 0, kind: input, shape index: {}]   ;;  %s201_s2 = inlined_call_operand.vmem [shape: f32[1,32], index: 2, kind: input, shape index: {}]   ;;  %s202_s3 = inlined_call_operand.vmem [shape: f32[16,32], index: 3, kind: input, shape index: {}]   ;;  %s203_s4 = inlined_call_operand.vmem [shape: f32[16,32], index: 4, kind: output, shape index: {}]  }
   0x1   :  { %126 = vmatprep.subr.bf16.mxu0 %v138_v0  ;;  %v136_v1 = vld [vmem:[%s199_s1] sm:$0xff]   ;;  %130 = vmatprep.mubr.msk.bf16.mxu0 %vm139_vm1, %v138_v0  ;;  %23 = vst.msk [vmem:[#allocation2] sm:$0xff] %vm22_vm0, %v138_v0  ;;  %24 = vst.msk [vmem:[#allocation2 + $0x8] sm:$0xff] %vm22_vm0, %v138_v0  ;;  %v137_v2 = vld [vmem:[%s199_s1 + $0x8] sm:$0xff]  }
   0x2   :  { %127 = vmatpush3.bf16.msra.mxu0 %v136_v1  ;;  %v27_v3 = vld [vmem:[%s200_s0] sm:$0xff]  ;;  %v28_v4 = vld [vmem:[%s200_s0 + $0x8] sm:$0xff] }
   0x3   :  { %128 = vmatprep.subr.bf16.mxu0 %v138_v0  ;;  %v29_v5 = vpack.c.bf16 %v28_v4, %v27_v3  ;;  %v122_v14 = vld [vmem:[%s201_s2] ss:$0 sm:$0xff]  ;;  %v110_v19 = vld [vmem:[%s202_s3 + $0x8] sm:$0xff] }
   0x4   :  { %v109_v16 = vld [vmem:[%s202_s3] sm:$0xff] }
   0x6   :  { %129 = vmatpush3.bf16.msra.mxu0 %v137_v2 }
   0x8   :  { %v25_v6 = vld [vmem:[#allocation2] sm:$0xff]  ;;  %v26_v8 = vld [vmem:[#allocation2 + $0x8] sm:$0xff] }
   0x9   :  { %131 = vmatmul.mubr.msk.bf16.vlgmr.msra.gmra.mrb[0].mxu0 %vm22_vm0, %v29_v5 }
  0xdc   :  { %v84_v7 = vpop.f32.mrb[0].mxu0 }
  0xdd   :  { %v91_v9 = vadd.f32 %v84_v7, %v25_v6  ;;  %v132_v10 = vpop.f32.mrb[1].mxu0 }
  0xde   :  { %v87_v11 = vpop.f32.mrb[2].mxu0 }
  0xdf   :  { %93 = vst.msk [vmem:[#allocation2] sm:$0xff] %vm22_vm0, %v91_v9  ;;  %v92_v12 = vadd.f32 %v87_v11, %v26_v8  ;;  %v133_v13 = vpop.f32.mrb[3].mxu0 }
  0xe1   :  { %94 = vst.msk [vmem:[#allocation2 + $0x8] sm:$0xff] %vm22_vm0, %v92_v12 }
  0xe6   :  { %v98_v15 = vld [vmem:[#allocation2] sm:$0xff] }
  0xe7   :  { %v107_v17 = vadd.f32 %v122_v14, %v98_v15 }
  0xe8   :  { %v99_v18 = vld [vmem:[#allocation2 + $0x8] sm:$0xff] }
  0xe9   :  { %v111_v20 = vadd.f32 %v109_v16, %v107_v17  ;;  %v108_v21 = vadd.f32 %v122_v14, %v99_v18 }
  0xeb   :  { %113 = vst.msk [vmem:[%s203_s4] sm:$0xff] %vm22_vm0, %v111_v20  ;;  %v112_v22 = vadd.f32 %v110_v19, %v108_v21 }
  0xed   :  { %114 = vst.msk [vmem:[%s203_s4 + $0x8] sm:$0xff] %vm22_vm0, %v112_v22 }

// kernel: gpt_with_activation_addition_forward.15
= control target key start
LH: loop header
LB: loop body
LE: loop exit
PB: predicated region body
PF: predicated region fallthrough
CT: control target
= control target key end

     0   :  { %vm23_vm0 = vcmask 261120   ;;  %v190_v15 = vmov 0.0   ;;  %vm191_vm1 = vmmov 0   ;;  %s254_s0 = inlined_call_operand.vmem [shape: f32[16,32], index: 0, kind: input, shape index: {}]   ;;  %s255_s3 = inlined_call_operand.vmem [shape: bf16[32,128], index: 3, kind: input, shape index: {}]   ;;  %s256_s1 = inlined_call_operand.vmem [shape: f32[1,32], index: 1, kind: input, shape index: {}]   ;;  %s257_s2 = inlined_call_operand.vmem [shape: f32[1,32], index: 2, kind: input, shape index: {}]   ;;  %s258_s4 = inlined_call_operand.vmem [shape: f32[1,128], index: 4, kind: input, shape index: {}]   ;;  %s259_s5 = inlined_call_operand.vmem [shape: f32[16,128], index: 5, kind: output, shape index: {}]  }
   0x1   :  { %v21_v0 = vld [vmem:[%s254_s0] sm:$0xff]  ;;  %v22_v1 = vld [vmem:[%s254_s0 + $0x8] sm:$0xff]  ;;  %170 = vmatprep.subr.bf16.mxu0 %v190_v15  ;;  %174 = vmatprep.mubr.msk.bf16.mxu0 %vm191_vm1, %v190_v15 }
   0x2   :  { %v24_v2 = vsel %vm23_vm0, %v21_v0, 0.0  ;;  %v27_v3 = vsel %vm23_vm0, %v22_v1, 0.0  ;;  %v180_v14 = vld [vmem:[%s255_s3] sm:$0xff]   ;;  %v181_v16 = vld [vmem:[%s255_s3 + $0x8] sm:$0xff]  }
   0x3   :  { %25 = vadd.xlane.f32.xlu0 %v24_v2  ;;  %171 = vmatpush3.bf16.msra.mxu0 %v180_v14  ;;  %v161_v25 = vld [vmem:[%s256_s1] ss:$0 sm:$0xff] }
   0x4   :  { %172 = vmatprep.subr.bf16.mxu0 %v190_v15  ;;  %v162_v29 = vld [vmem:[%s257_s2] ss:$0 sm:$0xff] }
   0x5   :  { %v163_v34 = vld [vmem:[%s258_s4] ss:$0 sm:$0xff] }
   0x7   :  { %28 = vadd.xlane.f32.xlu0 %v27_v3  ;;  %173 = vmatpush3.bf16.msra.mxu0 %v181_v16 }
  0x90   :  { %v26_v4 = vpop.xlane.xlu0 %25 }
  0x91   :  { %v31_v5 = vmul.f32 0.03125, %v26_v4 }
  0x93   :  { %v33_v6 = vsub.f32 %v21_v0, %v31_v5 }
  0x94   :  { %v29_v7 = vpop.xlane.xlu0 %28 }
  0x95   :  { %v32_v8 = vmul.f32 0.03125, %v29_v7  ;;  %v35_v9 = vmul.f32 %v33_v6, %v33_v6 }
  0x97   :  { %v34_v10 = vsub.f32 %v22_v1, %v32_v8  ;;  %v37_v11 = vsel %vm23_vm0, %v35_v9, 0.0 }
  0x98   :  { %38 = vadd.xlane.f32.xlu1 %v37_v11 }
  0x99   :  { %v36_v12 = vmul.f32 %v34_v10, %v34_v10 }
  0x9b   :  { %v40_v13 = vsel %vm23_vm0, %v36_v12, 0.0 }
  0x9c   :  { %41 = vadd.xlane.f32.xlu1 %v40_v13 }
 0x125   :  { %v39_v17 = vpop.xlane.xlu1 %38 }
 0x126   :  { %v43_v18 = vmul.f32 0.03125, %v39_v17 }
 0x128   :  { %v45_v19 = vadd.f32 1e-05, %v43_v18 }
 0x129   :  { %v42_v20 = vpop.xlane.xlu1 %41 }
 0x12a   :  { %182 = vrsqrt.f32 %v45_v19  ;;  %v44_v21 = vmul.f32 0.03125, %v42_v20 }
 0x12c   :  { %v46_v22 = vadd.f32 1e-05, %v44_v21 }
 0x12e   :  { %184 = vrsqrt.f32 %v46_v22 }
 0x134   :  { %v183_v23 = vpop.eup %182 }
 0x135   :  { %v49_v24 = vmul.f32 %v183_v23, %v33_v6 }
 0x137   :  { %v58_v28 = vmul.f32 %v161_v25, %v49_v24 }
 0x138   :  { %v185_v26 = vpop.eup %184 }
 0x139   :  { %v50_v27 = vmul.f32 %v185_v26, %v34_v10  ;;  %v67_v31 = vadd.f32 %v162_v29, %v58_v28 }
 0x13b   :  { %v59_v30 = vmul.f32 %v161_v25, %v50_v27 }
 0x13d   :  { %v68_v32 = vadd.f32 %v162_v29, %v59_v30 }
 0x13f   :  { %v69_v33 = vpack.c.bf16 %v68_v32, %v67_v31 }
 0x141   :  { %175 = vmatmul.mubr.msk.bf16.vlgmr.msra.gmra.mrb[0].mxu0 %vm23_vm0, %v69_v33 }
 0x214   :  { %v130_v35 = vpop.f32.mrb[0].mxu0 }
 0x215   :  { %v131_v36 = vadd.f32 %v163_v34, %v130_v35  ;;  %v176_v37 = vpop.f32.mrb[1].mxu0 }
 0x216   :  { %v133_v38 = vpop.f32.mrb[2].mxu0 }
 0x217   :  { %v139_v39 = vmul.f32 0.044715, %v131_v36  ;;  %v134_v40 = vadd.f32 %v163_v34, %v133_v38  ;;  %v177_v41 = vpop.f32.mrb[3].mxu0  ;;  %v137_v52 = vmul.f32 0.5, %v131_v36 }
 0x219   :  { %v141_v42 = vmul.f32 %v139_v39, %v131_v36  ;;  %v140_v43 = vmul.f32 0.044715, %v134_v40  ;;  %v138_v56 = vmul.f32 0.5, %v134_v40 }
 0x21b   :  { %v143_v44 = vmul.f32 %v141_v42, %v131_v36  ;;  %v142_v45 = vmul.f32 %v140_v43, %v134_v40 }
 0x21d   :  { %v145_v46 = vadd.f32 %v143_v44, %v131_v36  ;;  %v144_v47 = vmul.f32 %v142_v45, %v134_v40 }
 0x21f   :  { %v147_v48 = vmul.f32 0.7978846, %v145_v46  ;;  %v146_v49 = vadd.f32 %v144_v47, %v134_v40 }
 0x221   :  { %186 = vtanh.f32 %v147_v48  ;;  %v148_v50 = vmul.f32 0.7978846, %v146_v49 }
 0x223   :  { %188 = vtanh.f32 %v148_v50 }
 0x22b   :  { %v187_v51 = vpop.eup %186 }
 0x22c   :  { %v151_v53 = vadd.f32 1.0, %v187_v51 }
 0x22d   :  { %v189_v54 = vpop.eup %188 }
 0x22e   :  { %v153_v55 = vmul.f32 %v151_v53, %v137_v52  ;;  %v152_v57 = vadd.f32 1.0, %v189_v54 }
 0x230   :  { %155 = vst [vmem:[%s259_s5] sm:$0xff] %v153_v55  ;;  %v154_v58 = vmul.f32 %v152_v57, %v138_v56 }
 0x232   :  { %156 = vst [vmem:[%s259_s5 + $0x8] sm:$0xff] %v154_v58 }

// kernel: gpt_with_activation_addition_forward.12
= control target key start
LH: loop header
LB: loop body
LE: loop exit
PB: predicated region body
PF: predicated region fallthrough
CT: control target
= control target key end

     0   :  { %vm23_vm0 = vcmask 261120   ;;  %v169_v15 = vmov 0.0   ;;  %vm170_vm1 = vmmov 0   ;;  %vm137_vm2 = vcmask 785408   ;;  %s233_s0 = inlined_call_operand.vmem [shape: f32[16,32], index: 0, kind: input, shape index: {}]   ;;  %s234_s3 = inlined_call_operand.vmem [shape: bf16[32,96], index: 3, kind: input, shape index: {}]   ;;  %s235_s1 = inlined_call_operand.vmem [shape: f32[1,32], index: 1, kind: input, shape index: {}]   ;;  %s236_s2 = inlined_call_operand.vmem [shape: f32[1,32], index: 2, kind: input, shape index: {}]   ;;  %s237_s4 = inlined_call_operand.vmem [shape: f32[1,96], index: 4, kind: input, shape index: {}]   ;;  %s238_s5 = inlined_call_operand.vmem [shape: f32[16,96], index: 5, kind: output, shape index: {}]  }
   0x1   :  { %v21_v0 = vld [vmem:[%s233_s0] sm:$0xff]  ;;  %v22_v1 = vld [vmem:[%s233_s0 + $0x8] sm:$0xff]  ;;  %153 = vmatprep.subr.bf16.mxu0 %v169_v15  ;;  %157 = vmatprep.mubr.msk.bf16.mxu0 %vm170_vm1, %v169_v15 }
   0x2   :  { %v24_v2 = vsel %vm23_vm0, %v21_v0, 0.0  ;;  %v27_v3 = vsel %vm23_vm0, %v22_v1, 0.0  ;;  %v163_v14 = vld [vmem:[%s234_s3] sm:$0xff]   ;;  %v164_v16 = vld [vmem:[%s234_s3 + $0x8] sm:$0xff]  }
   0x3   :  { %25 = vadd.xlane.f32.xlu0 %v24_v2  ;;  %154 = vmatpush3.bf16.msra.mxu0 %v163_v14  ;;  %v144_v25 = vld [vmem:[%s235_s1] ss:$0 sm:$0xff] }
   0x4   :  { %155 = vmatprep.subr.bf16.mxu0 %v169_v15  ;;  %v145_v29 = vld [vmem:[%s236_s2] ss:$0 sm:$0xff] }
   0x5   :  { %v146_v34 = vld [vmem:[%s237_s4] ss:$0 sm:$0xff] }
   0x7   :  { %28 = vadd.xlane.f32.xlu0 %v27_v3  ;;  %156 = vmatpush3.bf16.msra.mxu0 %v164_v16 }
  0x90   :  { %v26_v4 = vpop.xlane.xlu0 %25 }
  0x91   :  { %v31_v5 = vmul.f32 0.03125, %v26_v4 }
  0x93   :  { %v33_v6 = vsub.f32 %v21_v0, %v31_v5 }
  0x94   :  { %v29_v7 = vpop.xlane.xlu0 %28 }
  0x95   :  { %v32_v8 = vmul.f32 0.03125, %v29_v7  ;;  %v35_v9 = vmul.f32 %v33_v6, %v33_v6 }
  0x97   :  { %v34_v10 = vsub.f32 %v22_v1, %v32_v8  ;;  %v37_v11 = vsel %vm23_vm0, %v35_v9, 0.0 }
  0x98   :  { %38 = vadd.xlane.f32.xlu1 %v37_v11 }
  0x99   :  { %v36_v12 = vmul.f32 %v34_v10, %v34_v10 }
  0x9b   :  { %v40_v13 = vsel %vm23_vm0, %v36_v12, 0.0 }
  0x9c   :  { %41 = vadd.xlane.f32.xlu1 %v40_v13 }
 0x125   :  { %v39_v17 = vpop.xlane.xlu1 %38 }
 0x126   :  { %v43_v18 = vmul.f32 0.03125, %v39_v17 }
 0x128   :  { %v45_v19 = vadd.f32 1e-05, %v43_v18 }
 0x129   :  { %v42_v20 = vpop.xlane.xlu1 %41 }
 0x12a   :  { %165 = vrsqrt.f32 %v45_v19  ;;  %v44_v21 = vmul.f32 0.03125, %v42_v20 }
 0x12c   :  { %v46_v22 = vadd.f32 1e-05, %v44_v21 }
 0x12e   :  { %167 = vrsqrt.f32 %v46_v22 }
 0x134   :  { %v166_v23 = vpop.eup %165 }
 0x135   :  { %v49_v24 = vmul.f32 %v166_v23, %v33_v6 }
 0x137   :  { %v58_v28 = vmul.f32 %v144_v25, %v49_v24 }
 0x138   :  { %v168_v26 = vpop.eup %167 }
 0x139   :  { %v50_v27 = vmul.f32 %v168_v26, %v34_v10  ;;  %v67_v31 = vadd.f32 %v145_v29, %v58_v28 }
 0x13b   :  { %v59_v30 = vmul.f32 %v144_v25, %v50_v27 }
 0x13d   :  { %v68_v32 = vadd.f32 %v145_v29, %v59_v30 }
 0x13f   :  { %v69_v33 = vpack.c.bf16 %v68_v32, %v67_v31 }
 0x141   :  { %158 = vmatmul.mubr.msk.bf16.vlgmr.msra.gmra.mrb[0].mxu0 %vm23_vm0, %v69_v33 }
 0x214   :  { %v130_v35 = vpop.f32.mrb[0].mxu0 }
 0x215   :  { %v131_v36 = vadd.f32 %v146_v34, %v130_v35  ;;  %v159_v37 = vpop.f32.mrb[1].mxu0 }
 0x216   :  { %v133_v38 = vpop.f32.mrb[2].mxu0 }
 0x217   :  { %138 = vst.msk [vmem:[%s238_s5] sm:$0xff] %vm137_vm2, %v131_v36  ;;  %v134_v39 = vadd.f32 %v146_v34, %v133_v38  ;;  %v160_v40 = vpop.f32.mrb[3].mxu0 }
 0x219   :  { %139 = vst.msk [vmem:[%s238_s5 + $0x8] sm:$0xff] %vm137_vm2, %v134_v39 }

// kernel: gpt_with_activation_addition_forward.13
= control target key start
LH: loop header
LB: loop body
LE: loop exit
PB: predicated region body
PF: predicated region fallthrough
CT: control target
= control target key end

     0   :  { %s501_s6 = smov 0   ;;  %s552_s0 = inlined_call_operand.vmem [shape: f32[2,8,96], index: 0, kind: input, shape index: {}]   ;;  %s553_s1 = inlined_call_operand.vmem [shape: f32[2,8,32], index: 1, kind: output, shape index: {}]  }
   0x1 LB: > { %s406_s7 = sadd.s32 4294967295, %s481_s6   ;;  %p410_p0 = scmp.ge.s32.totalorder %s481_s6, 1  ;;  %s481_s6 = sphi %s501_s6, %s11_s6  }
   0x2   : > { %p86_p1 = scmp.lt.s32.totalorder %s481_s6, 3 }
   0x4   : > { %p87_p2 = pnand %p410_p0, %p86_p1 }
   0x5   : > { %p104_p3 = scmp.lt.s32.totalorder (!%p87_p2), %s406_s7, 1  ;;  %v483_v0 = vmov (!%p87_p2), 0.0   ;;  %vm484_vm0 = vmmov (!%p87_p2), 0   ;;  %s485_s12 = smov (!%p87_p2), 96   ;;  %vm123_vm1 = vcmask (!%p87_p2), 130048   ;;  %v115_v5 = vlaneseq (!%p87_p2) }
   0x6   : > { %90 = sbr.rel (%p87_p2) target bundleno = 1541 (0x605), region = 24  ;;  %427 = vmatprep.subr.bf16.mxu0 (!%p87_p2), %v483_v0  ;;  %429 = vmatprep.mubr.msk.bf16.mxu0 (!%p87_p2), %vm484_vm0, %v483_v0  ;;  %s486_s13 = smov (!%p87_p2), 64   ;;  %vm172_vm3 = vcmask (!%p87_p2), 64512   ;;  %vm190_vm4 = vcmask (!%p87_p2), 1043456   ;;  %vm351_vm5 = vcmask (!%p87_p2), 261120  }
   0x7   : > { %433 = vmatprep.subr.bf16.mxu1 (!%p87_p2), %v483_v0  ;;  %435 = vmatprep.mubr.msk.bf16.mxu1 (!%p87_p2), %vm484_vm0, %v483_v0  ;;  %v116_v6 = vshrl.u32 (!%p87_p2), %v115_v5, 7  ;;  %v118_v7 = vand.u32 (!%p87_p2), 127, %v115_v5  ;;  %s487_s14 = smov (!%p87_p2), 80   ;;  %s488_s15 = smov (!%p87_p2), 112  }
   0x8   : > { %s489_s16 = smov (!%p87_p2), 48   ;;  %s490_s17 = smov (!%p87_p2), 16  }
   0x9   : > { %vm119_vm2 = vcmp.le.s32.totalorder (!%p87_p2), %v118_v7, %v116_v6 }
   0xd   : > { %s555_s7 = smov (!%p104_p3, %s406_s7), 1 }
   0xe   : > { %s411_s8 = sshll.u32 %s555_s7, 3 }
   0xf   : > { %s107_s11 = scalar_lea.vmem %s552_s0, %s411_s8  ;;  %s111_s20 = scalar_lea.vmem %s553_s1, %s411_s8 }
  0x10   : > { %v113_v1 = vld [vmem:[%s107_s11] sm:$0xff] }
  0x11   : > { %v519_v2 = vpack.c.bf16 %v113_v1, %v113_v1 }
  0x13   : > { %121 = vrot.lane.b32.xlu0 %v519_v2, %s485_s12  ;;  %185 = vrot.lane.b32.xlu1 %v519_v2, %s486_s13 }
  0x85   : > { %v122_v3 = vpop.permute.xlu0 %121  ;;  %v186_v15 = vpop.permute.xlu1 %185 }
  0x86   : > { %v128_v4 = vsel %vm123_vm1, %v122_v3, 0  ;;  %v192_v16 = vsel %vm190_vm4, %v186_v15, 0 }
  0x87   : > { %428 = vmatpush3.bf16.xpose.msra.mxu0 %v128_v4  ;;  %434 = vmatpush3.bf16.msra.mxu1 %v192_v16 }
  0x88   : > { %445 = vmatprep.subr.bf16.mxu0 %v483_v0  ;;  %439 = vmatprep.subr.bf16.mxu1 %v483_v0 }
  0x8e   : > { %430 = vmatmul.mubr.msk.bf16.vlgmr.msra.gmra.mrb[0].mxu0 %vm123_vm1, %v519_v2 }
  0x8f   : > { %447 = vmatprep.mubr.msk.bf16.mxu0 %vm484_vm0, %v483_v0 }
 0x161   : > { %v164_v8 = vpop.f32.mrb[0].mxu0 }
 0x162   : > { %v170_v9 = vmul.f32 0.25, %v164_v8  ;;  %v431_v10 = vpop.f32.mrb[1].mxu0 }
 0x163   : > { %v167_v11 = vpop.f32.mrb[2].mxu0 }
 0x164   : > { %v432_v12 = vpop.f32.mrb[3].mxu0  ;;  %v171_v13 = vsel %vm119_vm2, %v170_v9, -1e+30 }
 0x165   : > { %v173_v14 = vsel %vm172_vm3, %v171_v13, -inf }
 0x166   : > { %174 = vmax.xlane.f32.xlu0 %v173_v14 }
 0x1f3   : > { %v175_v17 = vpop.xlane.xlu0 %174 }
 0x1f4   : > { %v176_v18 = vsub.f32 %v171_v13, %v175_v17 }
 0x1f6   : > { %v177_v19 = vmul.f32 1.442695, %v176_v18 }
 0x1f8   : > { %467 = vpow2.f32 %v177_v19 }
 0x202   : > { %v468_v20 = vpop.eup %467 }
 0x203   : > { %v179_v21 = vsel %vm172_vm3, %v468_v20, 0.0 }
 0x204   : > { %180 = vadd.xlane.f32.xlu1 %v179_v21 }
 0x215   : > { %236 = vrot.lane.b32.xlu1 %v519_v2, %s487_s14 }
 0x219   : > { %234 = vrot.lane.b32.xlu1 %v519_v2, %s488_s15 }
 0x291   : > { %v181_v22 = vpop.xlane.xlu1 %180 }
 0x292   : > { %469 = vrcp.f32 %v181_v22 }
 0x295   : > { %v237_v24 = vpop.permute.xlu1 %236 }
 0x296   : > { %v242_v26 = vsel %vm123_vm1, %v237_v24, 0 }
 0x299   : > { %v235_v28 = vpop.permute.xlu1 %234 }
 0x29c   : > { %v470_v23 = vpop.eup %469 }
 0x29d   : > { %v183_v25 = vmul.f32 %v470_v23, %v468_v20 }
 0x29f   : > { %v184_v27 = vpack.c.bf16 %v183_v25, %v183_v25 }
 0x2a1   : > { %436 = vmatmul.mubr.msk.bf16.vlgmr.msra.gmra.mrb[0].mxu1 %vm172_vm3, %v184_v27 }
 0x2a2   : > { %440 = vmatpush3.bf16.xpose.msra.mxu1 %v242_v26  ;;  %441 = vmatprep.mubr.msk.bf16.mxu1 %vm484_vm0, %v483_v0 }
 0x2a9   : > { %442 = vmatmul.mubr.msk.bf16.vlgmr.msra.gmra.mrb[4].mxu1 %vm123_vm1, %v235_v28 }
 0x374   : > { %v228_v29 = vpop.f32.mrb[0].mxu1 }
 0x375   : > { %v437_v30 = vpop.f32.mrb[1].mxu1 }
 0x376   : > { %v231_v31 = vpop.f32.mrb[2].mxu1 }
 0x377   : > { %v438_v32 = vpop.f32.mrb[3].mxu1 }
 0x37c   : > { %v278_v33 = vpop.f32.mrb[4].mxu1 }
 0x37d   : > { %v284_v34 = vmul.f32 0.25, %v278_v33  ;;  %v443_v35 = vpop.f32.mrb[5].mxu1 }
 0x37e   : > { %v281_v36 = vpop.f32.mrb[6].mxu1 }
 0x37f   : > { %v444_v37 = vpop.f32.mrb[7].mxu1  ;;  %v285_v38 = vsel %vm119_vm2, %v284_v34, -1e+30 }
 0x380   : > { %v286_v39 = vsel %vm172_vm3, %v285_v38, -inf }
 0x381   : > { %287 = vmax.xlane.f32.xlu1 %v286_v39 }
 0x40e   : > { %v288_v40 = vpop.xlane.xlu1 %287 }
 0x40f   : > { %v289_v41 = vsub.f32 %v285_v38, %v288_v40 }
 0x411   : > { %v290_v42 = vmul.f32 1.442695, %v289_v41 }
 0x413   : > { %471 = vpow2.f32 %v290_v42 }
 0x41d   : > { %v472_v43 = vpop.eup %471 }
 0x41e   : > { %v292_v44 = vsel %vm172_vm3, %v472_v43, 0.0 }
 0x41f   : > { %293 = vadd.xlane.f32.xlu0 %v292_v44 }
 0x435   : > { %298 = vrot.lane.b32.xlu0 %v519_v2, %s489_s16 }
 0x4ac   : > { %v294_v45 = vpop.xlane.xlu0 %293 }
 0x4ad   : > { %473 = vrcp.f32 %v294_v45 }
 0x4b0   : > { %v299_v46 = vpop.permute.xlu0 %298 }
 0x4b1   : > { %v304_v47 = vsel %vm190_vm4, %v299_v46, 0 }
 0x4b2   : > { %446 = vmatpush3.bf16.msra.mxu0 %v304_v47 }
 0x4b7   : > { %v474_v48 = vpop.eup %473 }
 0x4b8   : > { %v296_v49 = vmul.f32 %v474_v48, %v472_v43 }
 0x4ba   : > { %v297_v50 = vpack.c.bf16 %v296_v49, %v296_v49 }
 0x4bc   : > { %448 = vmatmul.mubr.msk.bf16.vlgmr.msra.gmra.mrb[4].mxu0 %vm172_vm3, %v297_v50 }
 0x58f   : > { %v340_v51 = vpop.f32.mrb[4].mxu0 }
 0x590   : > { %347 = vrot.lane.b32.xlu0 %v340_v51, %s490_s17  ;;  %v449_v52 = vpop.f32.mrb[5].mxu0 }
 0x591   : > { %v343_v53 = vpop.f32.mrb[6].mxu0 }
 0x592   : > { %v450_v54 = vpop.f32.mrb[7].mxu0 }
 0x602   : > { %v348_v55 = vpop.permute.xlu0 %347 }
 0x603   : > { %v350_v56 = vsel %vm123_vm1, %v228_v29, %v348_v55 }
 0x604   : > { %352 = vst.msk [vmem:[%s111_s20] sm:$0xff] %vm351_vm5, %v350_v56 }
 0x605 PF: > { %s11_s6 = sadd.s32 1, %s481_s6  }
 0x606   : > { %p8_p4 = scmp.ge.s32.totalorder %s11_s6, 4  }
 0x608   :  { %10 = sbr.rel (!%p8_p4) target bundleno = 1 (0x1), region = 54 }

// kernel: gpt_with_activation_addition_forward.17
= control target key start
LH: loop header
LB: loop body
LE: loop exit
PB: predicated region body
PF: predicated region fallthrough
CT: control target
= control target key end

     0   :  { %vm22_vm0 = vcmask 261120   ;;  %s60_s0 = inlined_call_operand.vmem [shape: f32[16,32], index: 0, kind: input, shape index: {}]   ;;  %s61_s1 = inlined_call_operand.vmem [shape: f32[1,32], index: 1, kind: input, shape index: {}]   ;;  %s62_s2 = inlined_call_operand.vmem [shape: f32[16,32], index: 2, kind: output, shape index: {}]  }
   0x1   :  { %v11_v0 = vld [vmem:[%s60_s0] sm:$0xff]  ;;  %v12_v2 = vld [vmem:[%s60_s0 + $0x8] sm:$0xff] }
   0x2   :  { %v29_v1 = vld [vmem:[%s61_s1] ss:$0 sm:$0xff] }
   0x3   :  { %v20_v3 = vadd.f32 %v29_v1, %v11_v0  ;;  %v21_v4 = vadd.f32 %v29_v1, %v12_v2 }
   0x5   :  { %23 = vst.msk [vmem:[%s62_s2] sm:$0xff] %vm22_vm0, %v20_v3  ;;  %24 = vst.msk [vmem:[%s62_s2 + $0x8] sm:$0xff] %vm22_vm0, %v21_v4 }

// kernel: gpt_with_activation_addition_forward.23
= control target key start
LH: loop header
LB: loop body
LE: loop exit
PB: predicated region body
PF: predicated region fallthrough
CT: control target
= control target key end

     0   :  { %vm21_vm0 = vcmask 261120   ;;  %s295_s0 = inlined_call_operand.vmem [shape: f32[16,32], index: 0, kind: input, shape index: {}]   ;;  %s296_s1 = inlined_call_operand.vmem [shape: f32[1,32], index: 1, kind: input, shape index: {}]   ;;  %s297_s2 = inlined_call_operand.vmem [shape: f32[1,32], index: 2, kind: input, shape index: {}]   ;;  %s298_s3 = inlined_call_operand.vmem [shape: f32[64,32], index: 3, kind: input, shape index: {}]   ;;  %s299_s4 = inlined_call_operand.hbm [shape: f32[16,64], index: 4, kind: output, shape index: {}]  }
   0x1   :  { %v19_v0 = vld [vmem:[%s295_s0] sm:$0xff]  ;;  %v20_v1 = vld [vmem:[%s295_s0 + $0x8] sm:$0xff] }
   0x2   :  { %9 = vsyncpa [#allocation3], 0  ;;  %v22_v2 = vsel %vm21_vm0, %v19_v0, 0.0  ;;  %v25_v3 = vsel %vm21_vm0, %v20_v1, 0.0  ;;  %v68_v4 = vld [vmem:[%s298_s3] sm:$0xff]  ;;  %v69_v5 = vld [vmem:[%s298_s3 + $0x8] sm:$0xff] }
   0x3   :  { %23 = vadd.xlane.f32.xlu0 %v22_v2  ;;  %v208_v6 = vmov 0.0   ;;  %v76_v7 = vpack.c.bf16 %v69_v5, %v68_v4  ;;  %v70_v19 = vld [vmem:[%s298_s3 + $0x10] sm:$0xff]  ;;  %v71_v20 = vld [vmem:[%s298_s3 + $0x18] sm:$0xff]  ;;  %v72_v23 = vld [vmem:[%s298_s3 + $0x20] sm:$0xff]  ;;  %vm209_vm1 = vmmov 0   ;;  %s210_s11 = smov [#allocation2]  }
   0x4   :  { %163 = vmatprep.subr.bf16.mxu0 %v208_v6  ;;  %v77_v21 = vpack.c.bf16 %v71_v20, %v70_v19  ;;  %v73_v24 = vld [vmem:[%s298_s3 + $0x28] sm:$0xff]  ;;  %v74_v27 = vld [vmem:[%s298_s3 + $0x30] sm:$0xff]  ;;  %v75_v28 = vld [vmem:[%s298_s3 + $0x38] sm:$0xff]  ;;  %171 = vmatprep.mubr.msk.bf16.mxu0 %vm209_vm1, %v208_v6  ;;  %s144_s12 = sshll.u32 %s210_s11, 4  ;;  %vm136_vm2 = vcmask 523264   ;;  %s145_s12 = int_to_ptr.vmem [resolvable:$true] %s144_s12 }
   0x5   :  { %v84_v8 = vsel %vm21_vm0, %v76_v7, 0  ;;  %v78_v25 = vpack.c.bf16 %v73_v24, %v72_v23  ;;  %v79_v29 = vpack.c.bf16 %v75_v28, %v74_v27  ;;  %v155_v39 = vld [vmem:[%s296_s1] ss:$0 sm:$0xff]  ;;  %s184_s1 = scalar_lea.vmem %s145_s12, 256  ;;  %p189_p1 = scmp.lt.s32.totalorder %s145_s12, %s145_s12 }
   0x6   :  { %164 = vmatpush3.bf16.xpose.msra.mxu0 %v84_v8  ;;  %v87_v22 = vsel %vm21_vm0, %v77_v21, 0  ;;  %v156_v43 = vld [vmem:[%s297_s2] ss:$0 sm:$0xff]  ;;  %p185_p0 = scmp.ne.s32.totalorder %s145_s12, %s184_s1  ;;  %p190_p2 = scmp.lt.s32.totalorder %s184_s1, %s184_s1 }
   0x7   :  { %26 = vadd.xlane.f32.xlu0 %v25_v3  ;;  %165 = vmatprep.subr.bf16.mxu0 %v208_v6  ;;  %v90_v26 = vsel %vm21_vm0, %v78_v25, 0  ;;  %v93_v30 = vsel %vm21_vm0, %v79_v29, 0 }
   0x8   :  { %p191_p3 = por %p190_p2, %p189_p1 }
   0xa   :  { %p192_p4 = pnand %p191_p3, %p185_p0 }
   0xe   :  { %166 = vmatpush3.bf16.xpose.msra.mxu0 %v87_v22 }
   0xf   :  { %167 = vmatprep.subr.bf16.mxu0 %v208_v6 }
  0x16   :  { %168 = vmatpush3.bf16.xpose.msra.mxu0 %v90_v26 }
  0x17   :  { %169 = vmatprep.subr.bf16.mxu0 %v208_v6 }
  0x1e   :  { %170 = vmatpush3.bf16.xpose.msra.mxu0 %v93_v30 }
  0x90   :  { %v24_v9 = vpop.xlane.xlu0 %23 }
  0x91   :  { %v29_v10 = vmul.f32 0.03125, %v24_v9 }
  0x93   :  { %v31_v11 = vsub.f32 %v19_v0, %v29_v10 }
  0x94   :  { %v27_v12 = vpop.xlane.xlu0 %26 }
  0x95   :  { %v30_v13 = vmul.f32 0.03125, %v27_v12  ;;  %v33_v14 = vmul.f32 %v31_v11, %v31_v11 }
  0x97   :  { %v32_v15 = vsub.f32 %v20_v1, %v30_v13  ;;  %v35_v16 = vsel %vm21_vm0, %v33_v14, 0.0 }
  0x98   :  { %36 = vadd.xlane.f32.xlu1 %v35_v16 }
  0x99   :  { %v34_v17 = vmul.f32 %v32_v15, %v32_v15 }
  0x9b   :  { %v38_v18 = vsel %vm21_vm0, %v34_v17, 0.0 }
  0x9c   :  { %39 = vadd.xlane.f32.xlu1 %v38_v18 }
 0x125   :  { %v37_v31 = vpop.xlane.xlu1 %36 }
 0x126   :  { %v41_v32 = vmul.f32 0.03125, %v37_v31 }
 0x128   :  { %v43_v33 = vadd.f32 1e-05, %v41_v32 }
 0x129   :  { %v40_v34 = vpop.xlane.xlu1 %39 }
 0x12a   :  { %180 = vrsqrt.f32 %v43_v33  ;;  %v42_v35 = vmul.f32 0.03125, %v40_v34 }
 0x12c   :  { %v44_v36 = vadd.f32 1e-05, %v42_v35 }
 0x12e   :  { %182 = vrsqrt.f32 %v44_v36 }
 0x134   :  { %v181_v37 = vpop.eup %180 }
 0x135   :  { %v47_v38 = vmul.f32 %v181_v37, %v31_v11 }
 0x137   :  { %v56_v42 = vmul.f32 %v155_v39, %v47_v38 }
 0x138   :  { %v183_v40 = vpop.eup %182 }
 0x139   :  { %v48_v41 = vmul.f32 %v183_v40, %v32_v15  ;;  %v65_v45 = vadd.f32 %v156_v43, %v56_v42 }
 0x13b   :  { %v57_v44 = vmul.f32 %v155_v39, %v48_v41 }
 0x13d   :  { %v66_v46 = vadd.f32 %v156_v43, %v57_v44 }
 0x13f   :  { %v67_v47 = vpack.c.bf16 %v66_v46, %v65_v45 }
 0x141   :  { %172 = vmatmul.mubr.msk.bf16.vlgmr.msra.gmra.mrb[0].mxu0 %vm21_vm0, %v67_v47 }
 0x214   :  { %v129_v48 = vpop.f32.mrb[0].mxu0 }
 0x215   :  { %137 = vst.msk [vmem:[#allocation2] sm:$0xff] %vm136_vm2, %v129_v48  ;;  %v173_v49 = vpop.f32.mrb[1].mxu0 }
 0x216   :  { %v132_v50 = vpop.f32.mrb[2].mxu0 }
 0x217   :  { %138 = vst.msk [vmem:[#allocation2 + $0x8] sm:$0xff] %vm136_vm2, %v132_v50  ;;  %v174_v51 = vpop.f32.mrb[3].mxu0 }
 0x218   :  { %195 = shalt.err (!%p192_p4)
}
 0x219   :  { %s196_s14 = scalar_lea.hbm %s299_s4, 256 }
 0x21a   :  { %p197_p5 = scmp.ne.s32.totalorder %s299_s4, %s196_s14  ;;  %p200_p6 = scmp.lt.u32.totalorder %s196_s14, %s299_s4 }
 0x21c   :  { %p202_p7 = pnand %p200_p6, %p197_p5 }
 0x21e   :  { %205 = shalt.err (!%p202_p7)
}
 0x21f   :  { %s211_s19 = smov 128   ;;  %s212_s20 = smov 8  }
 0x220   :  { %150 = dma.vmem_to_hbm [thread:$0]  %s145_s12, 256, %s299_s4, [#allocation3], %s211_s19, %s211_s19, %s212_s20  }
 0x221   :  { %206 = dma.done.wait [#allocation3], 256  }
 0x222   :  { %207 = vsyncadd [#allocation3], 4294967040 }
 0x223   :  { %154 = vsyncpa [#allocation3], 1 }

// kernel: gpt_with_activation_addition_forward.16
= control target key start
LH: loop header
LB: loop body
LE: loop exit
PB: predicated region body
PF: predicated region fallthrough
CT: control target
= control target key end

     0   :  { %vm22_vm0 = vcmask 261120   ;;  %v212_v0 = vmov 0.0   ;;  %vm213_vm1 = vmmov 0   ;;  %s290_s1 = inlined_call_operand.vmem [shape: bf16[128,32], index: 1, kind: input, shape index: {}]   ;;  %s291_s0 = inlined_call_operand.vmem [shape: f32[16,128], index: 0, kind: input, shape index: {}]   ;;  %s292_s2 = inlined_call_operand.vmem [shape: f32[1,32], index: 2, kind: input, shape index: {}]   ;;  %s293_s3 = inlined_call_operand.vmem [shape: f32[16,32], index: 3, kind: input, shape index: {}]   ;;  %s294_s4 = inlined_call_operand.vmem [shape: f32[16,32], index: 4, kind: output, shape index: {}]  }
   0x1   :  { %182 = vmatprep.subr.bf16.mxu0 %v212_v0  ;;  %v204_v1 = vld [vmem:[%s290_s1] sm:$0xff]   ;;  %198 = vmatprep.mubr.msk.bf16.mxu0 %vm213_vm1, %v212_v0  ;;  %23 = vst.msk [vmem:[#allocation2] sm:$0xff] %vm22_vm0, %v212_v0  ;;  %24 = vst.msk [vmem:[#allocation2 + $0x8] sm:$0xff] %vm22_vm0, %v212_v0  ;;  %v205_v2 = vld [vmem:[%s290_s1 + $0x8] sm:$0xff]  }
   0x2   :  { %183 = vmatpush3.bf16.msra.mxu0 %v204_v1  ;;  %v206_v3 = vld [vmem:[%s290_s1 + $0x10] sm:$0xff]   ;;  %v207_v4 = vld [vmem:[%s290_s1 + $0x18] sm:$0xff]   ;;  %v208_v5 = vld [vmem:[%s290_s1 + $0x20] sm:$0xff]  }
   0x3   :  { %184 = vmatprep.subr.bf16.mxu0 %v212_v0  ;;  %v209_v6 = vld [vmem:[%s290_s1 + $0x28] sm:$0xff]   ;;  %v210_v7 = vld [vmem:[%s290_s1 + $0x30] sm:$0xff]   ;;  %v211_v8 = vld [vmem:[%s290_s1 + $0x38] sm:$0xff]  }
   0x4   :  { %v27_v9 = vld [vmem:[%s291_s0] sm:$0xff]  ;;  %v28_v10 = vld [vmem:[%s291_s0 + $0x8] sm:$0xff] }
   0x5   :  { %v29_v11 = vpack.c.bf16 %v28_v10, %v27_v9  ;;  %v172_v20 = vld [vmem:[%s292_s2] ss:$0 sm:$0xff]  ;;  %v155_v24 = vld [vmem:[%s293_s3 + $0x8] sm:$0xff] }
   0x6   :  { %185 = vmatpush3.bf16.msra.mxu0 %v205_v2  ;;  %v154_v22 = vld [vmem:[%s293_s3] sm:$0xff] }
   0x7   :  { %186 = vmatprep.subr.bf16.mxu0 %v212_v0 }
   0x8   :  { %v25_v12 = vld [vmem:[#allocation2] sm:$0xff]  ;;  %v26_v14 = vld [vmem:[#allocation2 + $0x8] sm:$0xff] }
   0xa   :  { %187 = vmatpush3.bf16.msra.mxu0 %v206_v3 }
   0xb   :  { %188 = vmatprep.subr.bf16.mxu0 %v212_v0 }
   0xe   :  { %189 = vmatpush3.bf16.msra.mxu0 %v207_v4 }
   0xf   :  { %190 = vmatprep.subr.bf16.mxu0 %v212_v0 }
  0x12   :  { %191 = vmatpush3.bf16.msra.mxu0 %v208_v5 }
  0x13   :  { %192 = vmatprep.subr.bf16.mxu0 %v212_v0 }
  0x16   :  { %193 = vmatpush3.bf16.msra.mxu0 %v209_v6 }
  0x17   :  { %194 = vmatprep.subr.bf16.mxu0 %v212_v0 }
  0x1a   :  { %195 = vmatpush3.bf16.msra.mxu0 %v210_v7 }
  0x1b   :  { %196 = vmatprep.subr.bf16.mxu0 %v212_v0 }
  0x1e   :  { %197 = vmatpush3.bf16.msra.mxu0 %v211_v8 }
  0x21   :  { %199 = vmatmul.mubr.bf16.vlgmr.msra.gmra.mrb[0].mxu0 %v29_v11 }
  0xf4   :  { %v128_v13 = vpop.f32.mrb[0].mxu0 }
  0xf5   :  { %v135_v15 = vadd.f32 %v128_v13, %v25_v12  ;;  %v200_v16 = vpop.f32.mrb[1].mxu0 }
  0xf6   :  { %v131_v17 = vpop.f32.mrb[2].mxu0 }
  0xf7   :  { %138 = vst.msk [vmem:[#allocation2] sm:$0xff] %vm22_vm0, %v135_v15  ;;  %v136_v18 = vadd.f32 %v131_v17, %v26_v14  ;;  %v201_v19 = vpop.f32.mrb[3].mxu0 }
  0xf9   :  { %139 = vst.msk [vmem:[#allocation2 + $0x8] sm:$0xff] %vm22_vm0, %v136_v18 }
  0xfe   :  { %v143_v21 = vld [vmem:[#allocation2] sm:$0xff] }
  0xff   :  { %v152_v23 = vadd.f32 %v172_v20, %v143_v21 }
 0x100   :  { %v144_v25 = vld [vmem:[#allocation2 + $0x8] sm:$0xff] }
 0x101   :  { %v156_v26 = vadd.f32 %v154_v22, %v152_v23  ;;  %v153_v27 = vadd.f32 %v172_v20, %v144_v25 }
 0x103   :  { %158 = vst.msk [vmem:[%s294_s4] sm:$0xff] %vm22_vm0, %v156_v26  ;;  %v157_v28 = vadd.f32 %v155_v24, %v153_v27 }
 0x105   :  { %159 = vst.msk [vmem:[%s294_s4 + $0x8] sm:$0xff] %vm22_vm0, %v157_v28 }

</bundles_post_ra>
